<compile_context>
chip_gen: v5e
topology: v5e:2x2
jax: 0.10.0
libtpu: 0.0.40
codegen_flags: <defaults>
</compile_context>

<pallas_src>
import jax
import jax.numpy as jnp
from jax.experimental import pallas as pl
from jax.experimental.pallas import tpu as pltpu


# ----------------------------------------------------------------------------
# Parameter packing: one f32 slab, column co-packed into 128-lane bands.
# ----------------------------------------------------------------------------

LANES = 128

SLAB_ORDER = (
    # DensePredictionNet.shared
    "sh_w1", "sh_b1", "sh_w2", "sh_b2",
    # DensePredictionNet.fusion
    "df_w1", "df_b1", "df_w2", "df_b2",
    # MatchHistoryEncoder.project
    "proj_w", "proj_b",
    # MatchHistoryEncoder.lstm (gates fused i|f|g|o along the output axis)
    "w_ih", "w_hh", "b_gates",
    # RNNtoDensePredictionNet.fusion (first Linear split for cat(h1, yf, h2))
    "rf_w1a", "rf_w1b", "rf_w1c", "rf_b1",
    "rf_w2", "rf_b2",
    # RNNtoDensePredictionNet.prediction
    "pred_w", "pred_b",
    # RNNtoDensePredictionNetWithOdds.fusion (first Linear split for cat(yd, odds))
    "of_w1a", "of_w1b", "of_b1",
    # final Linear padded to 128 output lanes -> lane-dense output store
    "of_w2p", "of_b2p",
)


def _pad8(n):
    return -(-n // 8) * 8


def pack_params(params):
    """Fuse LSTM gate params, pad the final Linear to 128 output lanes, and column
    co-pack everything into one (rows, 128) f32 slab.

    Returns (slab, offsets) where offsets[name] = (row_off, col_off, rows, cols), static.
    """
    fused = dict(params)
    fused["w_ih"] = jnp.concatenate(
        [params["wih_i"], params["wih_f"], params["wih_g"], params["wih_o"]], axis=1)
    fused["w_hh"] = jnp.concatenate(
        [params["whh_i"], params["whh_f"], params["whh_g"], params["whh_o"]], axis=1)
    fused["b_gates"] = jnp.concatenate(
        [params["bg_i"], params["bg_f"], params["bg_g"], params["bg_o"]], axis=1)
    nout = params["of_w2"].shape[1]
    fused["of_w2p"] = jnp.zeros((params["of_w2"].shape[0], LANES), jnp.float32
                                ).at[:, :nout].set(params["of_w2"].astype(jnp.float32))
    fused["of_b2p"] = jnp.zeros((1, LANES), jnp.float32
                                ).at[:, :nout].set(params["of_b2"].astype(jnp.float32))

    # Column co-packing: tensors with the same padded row count share a 128-lane band.
    # Widest first within each group so hot/wide weights (w_hh, DHxDH blocks) get col 0.
    order = sorted(SLAB_ORDER,
                   key=lambda n: (_pad8(fused[n].shape[0]), -fused[n].shape[1], n))
    offsets = {}
    bands = []           # [row_off, band_rows, col_cursor (8-aligned)]
    row_cursor = 0
    for name in order:
        r, c = fused[name].shape
        r8, c8 = _pad8(r), _pad8(c)
        for band in bands:
            if band[1] == r8 and band[2] + c <= LANES:
                offsets[name] = (band[0], band[2], r, c)
                band[2] += c8
                break
        else:
            offsets[name] = (row_cursor, 0, r, c)
            bands.append([row_cursor, r8, c8])
            row_cursor += r8

    slab = jnp.zeros((_pad8(row_cursor), LANES), jnp.float32)
    for name in SLAB_ORDER:
        ro, co, r, c = offsets[name]
        slab = slab.at[ro:ro + r, co:co + c].set(fused[name].astype(jnp.float32))
    return slab, offsets


# ----------------------------------------------------------------------------
# Kernel
# ----------------------------------------------------------------------------

def make_kernel(offsets, Bt, T, P, R, O):
    nB = 2 * Bt                       # both streams stacked along rows within a tile
    HO, CO, OO = P, P + R, P + 2 * R  # lane offsets inside the activation slab
    NOUT = 3

    def kernel(act_ref, hist_ref, slab_ref, out_ref):
        def W(name):
            ro, co, r, c = offsets[name]
            return slab_ref[ro:ro + r, co:co + c]      # static slice of the resident slab

        def mm(a, name):
            return jnp.dot(a, W(name), preferred_element_type=jnp.float32)

        def lin(a, wname, bname):
            return mm(a, wname) + W(bname)

        def recip(d):                                   # EUP vrcp + one Newton step
            r0 = pl.reciprocal(d, approx=True)
            return r0 * (2.0 - d * r0)

        relu = lambda v: jnp.maximum(v, 0.0)

        def softmax_rows(v):
            m = jnp.max(v, axis=-1, keepdims=True)
            e = jnp.exp(v - m)
            return e * recip(jnp.sum(e, axis=-1, keepdims=True))

        act = act_ref[...]                              # (2Bt, 128) packed activations
        x = act[:, 0:P]                                 # [x1 tile; x2 tile]
        h = act[:, HO:HO + R]                           # [h0_1 ; h0_2]
        c = act[:, CO:CO + R]                           # [c0_1 ; c0_2]
        od = act[0:Bt, OO:OO + O]                       # odds (stream-1 rows only)

        # ---- dpn.shared on both player streams at once (Dropout == id in eval) ----
        ys = relu(lin(x, "sh_w1", "sh_b1"))
        ys = relu(lin(ys, "sh_w2", "sh_b2"))
        yf = relu(lin(ys[:Bt] - ys[Bt:], "df_w1", "df_b1"))
        yf = relu(lin(yf, "df_w2", "df_b2"))

        # ---- MatchHistoryEncoder, both streams batched along rows ----
        # Input-dependent half hoisted out of the recurrence (batched over T*2Bt rows).
        xt_all = jnp.tanh(lin(hist_ref[...], "proj_w", "proj_b"))     # (T*2Bt, R)
        gx_all = lin(xt_all, "w_ih", "b_gates")                       # (T*2Bt, 4R)

        w_hh = W("w_hh")                                              # col 0 in the slab
        lane = jax.lax.broadcasted_iota(jnp.int32, (nB, 4 * R), 1)
        is_g = (lane >= 2 * R) & (lane < 3 * R)
        # sigmoid(v) == 0.5*tanh(0.5*v) + 0.5, so one full-width tanh per step covers all
        # four gates; scale/offset masks hoisted out of the serial loop.
        g_scale = jnp.where(is_g, 1.0, 0.5)
        g_shift = jnp.where(is_g, 0.0, 0.5)

        # TODO(synk): for large T switch to lax.fori_loop(..., unroll=k) and keep w_hh
        # MXU-resident via pltpu.matmul_push_rhs/matmul_acc_lhs (verify in bundle dump).
        for t in range(T):                               # static unroll; only h is serial
            gates = gx_all[t * nB:(t + 1) * nB, :] + jnp.dot(
                h, w_hh, preferred_element_type=jnp.float32)          # (2Bt, 4R)
            a = jnp.tanh(gates * g_scale) * g_scale + g_shift         # i,f,o:sigmoid g:tanh
            i = a[:, 0 * R:1 * R]
            f = a[:, 1 * R:2 * R]
            g = a[:, 2 * R:3 * R]
            o = a[:, 3 * R:4 * R]
            c = f * c + i * g
            h = o * jnp.tanh(c)
        h1, h2 = h[:Bt], h[Bt:]

        # ---- rnn.fusion(cat(h1, yf, h2)) via split-weight matmul ----
        z = relu(mm(h1, "rf_w1a") + mm(yf, "rf_w1b") + mm(h2, "rf_w1c") + W("rf_b1"))
        z = relu(lin(z, "rf_w2", "rf_b2"))

        # ---- rnn.prediction: Linear(DH, 3) + Softmax(dim=1) ----
        yd = softmax_rows(lin(z, "pred_w", "pred_b"))                 # (Bt, 3)

        # ---- outer: odds NaN -> 0, fusion(cat(yd, odds)), Softmax over first 3 lanes ----
        odc = jnp.where(jnp.isnan(od), jnp.zeros_like(od), od)
        u = relu(mm(yd, "of_w1a") + mm(odc, "of_w1b") + W("of_b1"))   # (Bt, 3)
        logits = lin(u, "of_w2p", "of_b2p")                           # (Bt, 128); lanes>=3 = 0
        out_lane = jax.lax.broadcasted_iota(jnp.int32, (Bt, LANES), 1)
        m = jnp.max(logits[:, 0:NOUT], axis=-1, keepdims=True)
        e = jnp.where(out_lane < NOUT, jnp.exp(logits - m), 0.0)
        out_ref[...] = e * recip(jnp.sum(e, axis=-1, keepdims=True))  # lane-dense store

    return kernel


# ----------------------------------------------------------------------------
# Wrapper
# ----------------------------------------------------------------------------

def forward(slab, offsets, x1, x2, hist1, hist2, hidden1, hidden2, odds, *, block_b=8):
    """Pallas forward. hidden1/hidden2 are (h, c) tuples shaped (1, B, R) like torch."""
    B, P = x1.shape
    T, _, HIN = hist1.shape
    R = hidden1[0].shape[-1]
    O = odds.shape[-1]

    Bt = min(block_b, B)                 # batch tile per grid step
    assert B % Bt == 0, "batch must be divisible by the batch tile"
    nT = B // Bt
    nB = 2 * Bt
    assert P + 2 * R + O <= LANES

    f32 = jnp.float32
    # ---- activation slab: x | h0 | c0 | odds packed along lanes; streams stacked per tile ----
    act = jnp.zeros((nT, 2, Bt, LANES), f32)
    act = act.at[:, 0, :, 0:P].set(x1.reshape(nT, Bt, P).astype(f32))
    act = act.at[:, 1, :, 0:P].set(x2.reshape(nT, Bt, P).astype(f32))
    act = act.at[:, 0, :, P:P + R].set(hidden1[0][0].reshape(nT, Bt, R).astype(f32))
    act = act.at[:, 1, :, P:P + R].set(hidden2[0][0].reshape(nT, Bt, R).astype(f32))
    act = act.at[:, 0, :, P + R:P + 2 * R].set(hidden1[1][0].reshape(nT, Bt, R).astype(f32))
    act = act.at[:, 1, :, P + R:P + 2 * R].set(hidden2[1][0].reshape(nT, Bt, R).astype(f32))
    act = act.at[:, 0, :, P + 2 * R:P + 2 * R + O].set(odds.reshape(nT, Bt, O).astype(f32))
    act = act.reshape(nT * nB, LANES)

    # ---- history slab: per tile, rows are (T, stream, Bt) row-major ----
    hist = jnp.stack([hist1, hist2], axis=1)                    # (T, 2, B, HIN)
    hist = hist.reshape(T, 2, nT, Bt, HIN).transpose(2, 0, 1, 3, 4)
    hist = hist.reshape(nT * T * nB, HIN).astype(f32)

    kernel = make_kernel(offsets, Bt, T, P, R, O)
    out = pl.pallas_call(
        kernel,
        out_shape=jax.ShapeDtypeStruct((B, LANES), jnp.float32),
        grid=(nT,),
        in_specs=[
            pl.BlockSpec((nB, LANES), lambda i: (i, 0)),        # per-tile activations
            pl.BlockSpec((T * nB, HIN), lambda i: (i, 0)),      # per-tile match history
            pl.BlockSpec(slab.shape, lambda i: (0, 0)),         # constant -> fetched once
        ],
        out_specs=pl.BlockSpec((Bt, LANES), lambda i: (i, 0)),  # lane-dense writeback
        compiler_params=pltpu.CompilerParams(
            dimension_semantics=("parallel",)),                 # v7x: shard tiles over 2 TCs
    )(act, hist, slab)
    return out[:, :3]


# ----------------------------------------------------------------------------
# Pure-JAX reference (mirrors the PyTorch forward, eval mode, per-gate params)
# ----------------------------------------------------------------------------

def reference(params, x1, x2, hist1, hist2, hidden1, hidden2, odds):
    p = params
    relu = jax.nn.relu

    def shared(x):
        h = relu(x @ p["sh_w1"] + p["sh_b1"])
        return relu(h @ p["sh_w2"] + p["sh_b2"])

    y1, y2 = shared(x1), shared(x2)
    yf = relu((y1 - y2) @ p["df_w1"] + p["df_b1"])
    yf = relu(yf @ p["df_w2"] + p["df_b2"])

    def encode(hist, hc):
        h, c = hc[0][0], hc[1][0]
        for t in range(hist.shape[0]):
            xt = jnp.tanh(hist[t] @ p["proj_w"] + p["proj_b"])
            i = jax.nn.sigmoid(xt @ p["wih_i"] + h @ p["whh_i"] + p["bg_i"])
            f = jax.nn.sigmoid(xt @ p["wih_f"] + h @ p["whh_f"] + p["bg_f"])
            g = jnp.tanh(xt @ p["wih_g"] + h @ p["whh_g"] + p["bg_g"])
            o = jax.nn.sigmoid(xt @ p["wih_o"] + h @ p["whh_o"] + p["bg_o"])
            c = f * c + i * g
            h = o * jnp.tanh(c)
        return h

    h1 = encode(hist1, hidden1)
    h2 = encode(hist2, hidden2)
    z = relu(h1 @ p["rf_w1a"] + yf @ p["rf_w1b"] + h2 @ p["rf_w1c"] + p["rf_b1"])
    z = relu(z @ p["rf_w2"] + p["rf_b2"])
    yd = jax.nn.softmax(z @ p["pred_w"] + p["pred_b"], axis=1)
    od = jnp.where(jnp.isnan(odds), 0.0, odds)
    u = relu(yd @ p["of_w1a"] + od @ p["of_w1b"] + p["of_b1"])
    return jax.nn.softmax(u @ p["of_w2"] + p["of_b2"], axis=1)


# ----------------------------------------------------------------------------
# Parameter init (PyTorch-style per-gate layout; fusing/packing done separately)
# ----------------------------------------------------------------------------

def init_params(key, P, HIN, O, DH, R):
    keys = iter(jax.random.split(key, 64))

    def w(shape, scale=0.1):
        return jax.random.normal(next(keys), shape, jnp.float32) * scale

    def b(n, scale=0.05):
        return jax.random.normal(next(keys), (1, n), jnp.float32) * scale

    shapes_w = {
        "sh_w1": (P, DH), "sh_w2": (DH, DH),
        "df_w1": (DH, DH), "df_w2": (DH, DH),
        "proj_w": (HIN, R),
        "wih_i": (R, R), "wih_f": (R, R), "wih_g": (R, R), "wih_o": (R, R),
        "whh_i": (R, R), "whh_f": (R, R), "whh_g": (R, R), "whh_o": (R, R),
        "rf_w1a": (R, DH), "rf_w1b": (DH, DH), "rf_w1c": (R, DH),
        "rf_w2": (DH, DH),
        "pred_w": (DH, 3),
        "of_w1a": (3, 3), "of_w1b": (O, 3),
        "of_w2": (3, 3),
    }
    shapes_b = {
        "sh_b1": DH, "sh_b2": DH, "df_b1": DH, "df_b2": DH,
        "proj_b": R,
        "bg_i": R, "bg_f": R, "bg_g": R, "bg_o": R,
        "rf_b1": DH, "rf_b2": DH,
        "pred_b": 3, "of_b1": 3, "of_b2": 3,
    }
    params = {}
    for name, shape in shapes_w.items():
        params[name] = w(shape)
    for name, n in shapes_b.items():
        params[name] = b(n)
    return params


if __name__ == "__main__":
    B = 16         # batch (two grid steps of Bt=8 -> exercises the batch grid)
    P = 16         # player_input_size
    HIN = 8        # history_input_size
    O = 3          # odds_input_size
    DH = 32        # dn_hidden_size
    R = 16         # rnn_hidden_size
    T = 4          # match-history sequence length
    Bt = 8         # batch tile per grid step (go bigger at production batch sizes)

    key = jax.random.PRNGKey(0)
    kp, kx1, kx2, kh1, kh2, ko, khc = jax.random.split(key, 7)

    params = init_params(kp, P, HIN, O, DH, R)
    slab, offsets = pack_params(params)     # one-time host-side packing

    x1 = jax.random.normal(kx1, (B, P), jnp.float32)
    x2 = jax.random.normal(kx2, (B, P), jnp.float32)
    hist1 = jax.random.normal(kh1, (T, B, HIN), jnp.float32)
    hist2 = jax.random.normal(kh2, (T, B, HIN), jnp.float32)
    odds = jax.random.normal(ko, (B, O), jnp.float32)
    odds = odds.at[0, 1].set(jnp.nan).at[3, 0].set(jnp.nan).at[9, 2].set(jnp.nan)

    hk = jax.random.split(khc, 4)
    hidden1 = (0.1 * jax.random.normal(hk[0], (1, B, R), jnp.float32),
               0.1 * jax.random.normal(hk[1], (1, B, R), jnp.float32))
    hidden2 = (0.1 * jax.random.normal(hk[2], (1, B, R), jnp.float32),
               0.1 * jax.random.normal(hk[3], (1, B, R), jnp.float32))

    out = forward(slab, offsets, x1, x2, hist1, hist2, hidden1, hidden2, odds,
                  block_b=Bt)
    out = jax.block_until_ready(out)

    ref = reference(params, x1, x2, hist1, hist2, hidden1, hidden2, odds)
    assert out.shape == (B, 3)
    assert bool(jnp.all(jnp.isfinite(out)))
    assert bool(jnp.allclose(out, ref, atol=3e-5, rtol=1e-4)), "mismatch vs reference"

    print("KERNEL_OK")
</pallas_src>

<mosaic_0001>
module attributes {stable_mosaic.version = 11 : i64} {
  func.func @kernel(%arg0: i32, %arg1: memref<16x128xf32, #tpu.memory_space<vmem>>, %arg2: memref<64x8xf32, #tpu.memory_space<vmem>>, %arg3: memref<136x128xf32, #tpu.memory_space<vmem>>, %arg4: memref<8x128xf32, #tpu.memory_space<vmem>>) attributes {dimension_semantics = [#tpu.dimension_semantics<parallel>], iteration_bounds = array<i64: 2>, scalar_prefetch = 0 : i64, scratch_operands = 0 : i64, tpu.core_type = #tpu.core_type<tc>, window_params = [{transform_indices = @transform_0, window_bounds = array<i64: 16, 128>}, {transform_indices = @transform_1, window_bounds = array<i64: 64, 8>}, {pipeline_mode = #tpu.pipeline_mode<synchronous>, transform_indices = @transform_2, window_bounds = array<i64: 136, 128>}, {transform_indices = @transform_3, window_bounds = array<i64: 8, 128>}]} {
    %c0 = arith.constant 0 : index
    %c0_0 = arith.constant 0 : index
    %0 = vector.load %arg1[%c0, %c0_0] : memref<16x128xf32, #tpu.memory_space<vmem>>, vector<16x128xf32>
    %1 = vector.extract_strided_slice %0 {offsets = [0, 0], sizes = [16, 16], strides = [1, 1]} : vector<16x128xf32> to vector<16x16xf32>
    %2 = vector.extract_strided_slice %0 {offsets = [0, 16], sizes = [16, 16], strides = [1, 1]} : vector<16x128xf32> to vector<16x16xf32>
    %3 = vector.extract_strided_slice %0 {offsets = [0, 32], sizes = [16, 16], strides = [1, 1]} : vector<16x128xf32> to vector<16x16xf32>
    %4 = vector.extract_strided_slice %0 {offsets = [0, 48], sizes = [8, 3], strides = [1, 1]} : vector<16x128xf32> to vector<8x3xf32>
    %c56 = arith.constant 56 : index
    %c64 = arith.constant 64 : index
    %5 = vector.load %arg3[%c56, %c64] : memref<136x128xf32, #tpu.memory_space<vmem>>, vector<16x32xf32>
    %cst = arith.constant dense<0.000000e+00> : vector<16x32xf32>
    %6 = tpu.matmul %1, %5, %cst {dimension_numbers = #tpu.dot_dimension_numbers<[1], [0], [0], [1], [0, 0, 1, 1], [], []>} : vector<16x16xf32>, vector<16x32xf32>, vector<16x32xf32> -> vector<16x32xf32>
    %c24 = arith.constant 24 : index
    %c64_1 = arith.constant 64 : index
    %7 = vector.load %arg3[%c24, %c64_1] : memref<136x128xf32, #tpu.memory_space<vmem>>, vector<1x32xf32>
    %8 = vector.broadcast %7 : vector<1x32xf32> to vector<16x32xf32>
    %9 = arith.addf %6, %8 : vector<16x32xf32>
    %cst_2 = arith.constant 0.000000e+00 : f32
    %10 = vector.broadcast %cst_2 : f32 to vector<16x32xf32>
    %11 = arith.maximumf %9, %10 : vector<16x32xf32>
    %c104 = arith.constant 104 : index
    %c0_3 = arith.constant 0 : index
    %12 = vector.load %arg3[%c104, %c0_3] : memref<136x128xf32, #tpu.memory_space<vmem>>, vector<32x32xf32>
    %cst_4 = arith.constant dense<0.000000e+00> : vector<16x32xf32>
    %13 = tpu.matmul %11, %12, %cst_4 {dimension_numbers = #tpu.dot_dimension_numbers<[1], [0], [0], [1], [0, 0, 1, 1], [], []>} : vector<16x32xf32>, vector<32x32xf32>, vector<16x32xf32> -> vector<16x32xf32>
    %c24_5 = arith.constant 24 : index
    %c96 = arith.constant 96 : index
    %14 = vector.load %arg3[%c24_5, %c96] : memref<136x128xf32, #tpu.memory_space<vmem>>, vector<1x32xf32>
    %15 = vector.broadcast %14 : vector<1x32xf32> to vector<16x32xf32>
    %16 = arith.addf %13, %15 : vector<16x32xf32>
    %cst_6 = arith.constant 0.000000e+00 : f32
    %17 = vector.broadcast %cst_6 : f32 to vector<16x32xf32>
    %18 = arith.maximumf %16, %17 : vector<16x32xf32>
    %19 = vector.extract_strided_slice %18 {offsets = [0, 0], sizes = [8, 32], strides = [1, 1]} : vector<16x32xf32> to vector<8x32xf32>
    %20 = vector.extract_strided_slice %18 {offsets = [8, 0], sizes = [8, 32], strides = [1, 1]} : vector<16x32xf32> to vector<8x32xf32>
    %21 = arith.subf %19, %20 : vector<8x32xf32>
    %c72 = arith.constant 72 : index
    %c0_7 = arith.constant 0 : index
    %22 = vector.load %arg3[%c72, %c0_7] : memref<136x128xf32, #tpu.memory_space<vmem>>, vector<32x32xf32>
    %cst_8 = arith.constant dense<0.000000e+00> : vector<8x32xf32>
    %23 = tpu.matmul %21, %22, %cst_8 {dimension_numbers = #tpu.dot_dimension_numbers<[1], [0], [0], [1], [0, 0, 1, 1], [], []>} : vector<8x32xf32>, vector<32x32xf32>, vector<8x32xf32> -> vector<8x32xf32>
    %c16 = arith.constant 16 : index
    %c64_9 = arith.constant 64 : index
    %24 = vector.load %arg3[%c16, %c64_9] : memref<136x128xf32, #tpu.memory_space<vmem>>, vector<1x32xf32>
    %25 = vector.broadcast %24 : vector<1x32xf32> to vector<8x32xf32>
    %26 = arith.addf %23, %25 : vector<8x32xf32>
    %cst_10 = arith.constant 0.000000e+00 : f32
    %27 = vector.broadcast %cst_10 : f32 to vector<8x32xf32>
    %28 = arith.maximumf %26, %27 : vector<8x32xf32>
    %c72_11 = arith.constant 72 : index
    %c32 = arith.constant 32 : index
    %29 = vector.load %arg3[%c72_11, %c32] : memref<136x128xf32, #tpu.memory_space<vmem>>, vector<32x32xf32>
    %cst_12 = arith.constant dense<0.000000e+00> : vector<8x32xf32>
    %30 = tpu.matmul %28, %29, %cst_12 {dimension_numbers = #tpu.dot_dimension_numbers<[1], [0], [0], [1], [0, 0, 1, 1], [], []>} : vector<8x32xf32>, vector<32x32xf32>, vector<8x32xf32> -> vector<8x32xf32>
    %c16_13 = arith.constant 16 : index
    %c96_14 = arith.constant 96 : index
    %31 = vector.load %arg3[%c16_13, %c96_14] : memref<136x128xf32, #tpu.memory_space<vmem>>, vector<1x32xf32>
    %32 = vector.broadcast %31 : vector<1x32xf32> to vector<8x32xf32>
    %33 = arith.addf %30, %32 : vector<8x32xf32>
    %cst_15 = arith.constant 0.000000e+00 : f32
    %34 = vector.broadcast %cst_15 : f32 to vector<8x32xf32>
    %35 = arith.maximumf %33, %34 : vector<8x32xf32>
    %c0_16 = arith.constant 0 : index
    %c0_17 = arith.constant 0 : index
    %36 = vector.load %arg2[%c0_16, %c0_17] : memref<64x8xf32, #tpu.memory_space<vmem>>, vector<64x8xf32>
    %c32_18 = arith.constant 32 : index
    %c16_19 = arith.constant 16 : index
    %37 = vector.load %arg3[%c32_18, %c16_19] : memref<136x128xf32, #tpu.memory_space<vmem>>, vector<8x16xf32>
    %cst_20 = arith.constant dense<0.000000e+00> : vector<64x16xf32>
    %38 = tpu.matmul %36, %37, %cst_20 {dimension_numbers = #tpu.dot_dimension_numbers<[1], [0], [0], [1], [0, 0, 1, 1], [], []>} : vector<64x8xf32>, vector<8x16xf32>, vector<64x16xf32> -> vector<64x16xf32>
    %c32_21 = arith.constant 32 : index
    %c0_22 = arith.constant 0 : index
    %39 = vector.load %arg3[%c32_21, %c0_22] : memref<136x128xf32, #tpu.memory_space<vmem>>, vector<1x16xf32>
    %40 = vector.broadcast %39 : vector<1x16xf32> to vector<64x16xf32>
    %41 = arith.addf %38, %40 : vector<64x16xf32>
    %42 = math.tanh %41 : vector<64x16xf32>
    %c40 = arith.constant 40 : index
    %c64_23 = arith.constant 64 : index
    %43 = vector.load %arg3[%c40, %c64_23] : memref<136x128xf32, #tpu.memory_space<vmem>>, vector<16x64xf32>
    %cst_24 = arith.constant dense<0.000000e+00> : vector<64x64xf32>
    %44 = tpu.matmul %42, %43, %cst_24 {dimension_numbers = #tpu.dot_dimension_numbers<[1], [0], [0], [1], [0, 0, 1, 1], [], []>} : vector<64x16xf32>, vector<16x64xf32>, vector<64x64xf32> -> vector<64x64xf32>
    %c16_25 = arith.constant 16 : index
    %c0_26 = arith.constant 0 : index
    %45 = vector.load %arg3[%c16_25, %c0_26] : memref<136x128xf32, #tpu.memory_space<vmem>>, vector<1x64xf32>
    %46 = vector.broadcast %45 : vector<1x64xf32> to vector<64x64xf32>
    %47 = arith.addf %44, %46 : vector<64x64xf32>
    %c40_27 = arith.constant 40 : index
    %c0_28 = arith.constant 0 : index
    %48 = vector.load %arg3[%c40_27, %c0_28] : memref<136x128xf32, #tpu.memory_space<vmem>>, vector<16x64xf32>
    %49 = tpu.iota {dimensions = array<i32: 1>} : vector<16x64xi32>
    %c32_i32 = arith.constant 32 : i32
    %50 = vector.broadcast %c32_i32 : i32 to vector<16x64xi32>
    %51 = arith.cmpi sge, %49, %50 : vector<16x64xi32>
    %c48_i32 = arith.constant 48 : i32
    %52 = vector.broadcast %c48_i32 : i32 to vector<16x64xi32>
    %53 = arith.cmpi slt, %49, %52 : vector<16x64xi32>
    %54 = arith.andi %51, %53 : vector<16x64xi1>
    %cst_29 = arith.constant 1.000000e+00 : f32
    %cst_30 = arith.constant 5.000000e-01 : f32
    %55 = vector.broadcast %cst_29 : f32 to vector<16x64xf32>
    %56 = vector.broadcast %cst_30 : f32 to vector<16x64xf32>
    %57 = arith.select %54, %55, %56 : vector<16x64xi1>, vector<16x64xf32>
    %cst_31 = arith.constant 0.000000e+00 : f32
    %cst_32 = arith.constant 5.000000e-01 : f32
    %58 = vector.broadcast %cst_31 : f32 to vector<16x64xf32>
    %59 = vector.broadcast %cst_32 : f32 to vector<16x64xf32>
    %60 = arith.select %54, %58, %59 : vector<16x64xi1>, vector<16x64xf32>
    %61 = vector.extract_strided_slice %47 {offsets = [0, 0], sizes = [16, 64], strides = [1, 1]} : vector<64x64xf32> to vector<16x64xf32>
    %cst_33 = arith.constant dense<0.000000e+00> : vector<16x64xf32>
    %62 = tpu.matmul %2, %48, %cst_33 {dimension_numbers = #tpu.dot_dimension_numbers<[1], [0], [0], [1], [0, 0, 1, 1], [], []>} : vector<16x16xf32>, vector<16x64xf32>, vector<16x64xf32> -> vector<16x64xf32>
    %63 = arith.addf %61, %62 : vector<16x64xf32>
    %64 = arith.mulf %63, %57 : vector<16x64xf32>
    %65 = math.tanh %64 : vector<16x64xf32>
    %66 = arith.mulf %65, %57 : vector<16x64xf32>
    %67 = arith.addf %66, %60 : vector<16x64xf32>
    %68 = vector.extract_strided_slice %67 {offsets = [0, 0], sizes = [16, 16], strides = [1, 1]} : vector<16x64xf32> to vector<16x16xf32>
    %69 = vector.extract_strided_slice %67 {offsets = [0, 16], sizes = [16, 16], strides = [1, 1]} : vector<16x64xf32> to vector<16x16xf32>
    %70 = vector.extract_strided_slice %67 {offsets = [0, 32], sizes = [16, 16], strides = [1, 1]} : vector<16x64xf32> to vector<16x16xf32>
    %71 = vector.extract_strided_slice %67 {offsets = [0, 48], sizes = [16, 16], strides = [1, 1]} : vector<16x64xf32> to vector<16x16xf32>
    %72 = arith.mulf %69, %3 : vector<16x16xf32>
    %73 = arith.mulf %68, %70 : vector<16x16xf32>
    %74 = arith.addf %72, %73 : vector<16x16xf32>
    %75 = math.tanh %74 : vector<16x16xf32>
    %76 = arith.mulf %71, %75 : vector<16x16xf32>
    %77 = vector.extract_strided_slice %47 {offsets = [16, 0], sizes = [16, 64], strides = [1, 1]} : vector<64x64xf32> to vector<16x64xf32>
    %cst_34 = arith.constant dense<0.000000e+00> : vector<16x64xf32>
    %78 = tpu.matmul %76, %48, %cst_34 {dimension_numbers = #tpu.dot_dimension_numbers<[1], [0], [0], [1], [0, 0, 1, 1], [], []>} : vector<16x16xf32>, vector<16x64xf32>, vector<16x64xf32> -> vector<16x64xf32>
    %79 = arith.addf %77, %78 : vector<16x64xf32>
    %80 = arith.mulf %79, %57 : vector<16x64xf32>
    %81 = math.tanh %80 : vector<16x64xf32>
    %82 = arith.mulf %81, %57 : vector<16x64xf32>
    %83 = arith.addf %82, %60 : vector<16x64xf32>
    %84 = vector.extract_strided_slice %83 {offsets = [0, 0], sizes = [16, 16], strides = [1, 1]} : vector<16x64xf32> to vector<16x16xf32>
    %85 = vector.extract_strided_slice %83 {offsets = [0, 16], sizes = [16, 16], strides = [1, 1]} : vector<16x64xf32> to vector<16x16xf32>
    %86 = vector.extract_strided_slice %83 {offsets = [0, 32], sizes = [16, 16], strides = [1, 1]} : vector<16x64xf32> to vector<16x16xf32>
    %87 = vector.extract_strided_slice %83 {offsets = [0, 48], sizes = [16, 16], strides = [1, 1]} : vector<16x64xf32> to vector<16x16xf32>
    %88 = arith.mulf %85, %74 : vector<16x16xf32>
    %89 = arith.mulf %84, %86 : vector<16x16xf32>
    %90 = arith.addf %88, %89 : vector<16x16xf32>
    %91 = math.tanh %90 : vector<16x16xf32>
    %92 = arith.mulf %87, %91 : vector<16x16xf32>
    %93 = vector.extract_strided_slice %47 {offsets = [32, 0], sizes = [16, 64], strides = [1, 1]} : vector<64x64xf32> to vector<16x64xf32>
    %cst_35 = arith.constant dense<0.000000e+00> : vector<16x64xf32>
    %94 = tpu.matmul %92, %48, %cst_35 {dimension_numbers = #tpu.dot_dimension_numbers<[1], [0], [0], [1], [0, 0, 1, 1], [], []>} : vector<16x16xf32>, vector<16x64xf32>, vector<16x64xf32> -> vector<16x64xf32>
    %95 = arith.addf %93, %94 : vector<16x64xf32>
    %96 = arith.mulf %95, %57 : vector<16x64xf32>
    %97 = math.tanh %96 : vector<16x64xf32>
    %98 = arith.mulf %97, %57 : vector<16x64xf32>
    %99 = arith.addf %98, %60 : vector<16x64xf32>
    %100 = vector.extract_strided_slice %99 {offsets = [0, 0], sizes = [16, 16], strides = [1, 1]} : vector<16x64xf32> to vector<16x16xf32>
    %101 = vector.extract_strided_slice %99 {offsets = [0, 16], sizes = [16, 16], strides = [1, 1]} : vector<16x64xf32> to vector<16x16xf32>
    %102 = vector.extract_strided_slice %99 {offsets = [0, 32], sizes = [16, 16], strides = [1, 1]} : vector<16x64xf32> to vector<16x16xf32>
    %103 = vector.extract_strided_slice %99 {offsets = [0, 48], sizes = [16, 16], strides = [1, 1]} : vector<16x64xf32> to vector<16x16xf32>
    %104 = arith.mulf %101, %90 : vector<16x16xf32>
    %105 = arith.mulf %100, %102 : vector<16x16xf32>
    %106 = arith.addf %104, %105 : vector<16x16xf32>
    %107 = math.tanh %106 : vector<16x16xf32>
    %108 = arith.mulf %103, %107 : vector<16x16xf32>
    %109 = vector.extract_strided_slice %47 {offsets = [48, 0], sizes = [16, 64], strides = [1, 1]} : vector<64x64xf32> to vector<16x64xf32>
    %cst_36 = arith.constant dense<0.000000e+00> : vector<16x64xf32>
    %110 = tpu.matmul %108, %48, %cst_36 {dimension_numbers = #tpu.dot_dimension_numbers<[1], [0], [0], [1], [0, 0, 1, 1], [], []>} : vector<16x16xf32>, vector<16x64xf32>, vector<16x64xf32> -> vector<16x64xf32>
    %111 = arith.addf %109, %110 : vector<16x64xf32>
    %112 = arith.mulf %111, %57 : vector<16x64xf32>
    %113 = math.tanh %112 : vector<16x64xf32>
    %114 = arith.mulf %113, %57 : vector<16x64xf32>
    %115 = arith.addf %114, %60 : vector<16x64xf32>
    %116 = vector.extract_strided_slice %115 {offsets = [0, 0], sizes = [16, 16], strides = [1, 1]} : vector<16x64xf32> to vector<16x16xf32>
    %117 = vector.extract_strided_slice %115 {offsets = [0, 16], sizes = [16, 16], strides = [1, 1]} : vector<16x64xf32> to vector<16x16xf32>
    %118 = vector.extract_strided_slice %115 {offsets = [0, 32], sizes = [16, 16], strides = [1, 1]} : vector<16x64xf32> to vector<16x16xf32>
    %119 = vector.extract_strided_slice %115 {offsets = [0, 48], sizes = [16, 16], strides = [1, 1]} : vector<16x64xf32> to vector<16x16xf32>
    %120 = arith.mulf %117, %106 : vector<16x16xf32>
    %121 = arith.mulf %116, %118 : vector<16x16xf32>
    %122 = arith.addf %120, %121 : vector<16x16xf32>
    %123 = math.tanh %122 : vector<16x16xf32>
    %124 = arith.mulf %119, %123 : vector<16x16xf32>
    %125 = vector.extract_strided_slice %124 {offsets = [0, 0], sizes = [8, 16], strides = [1, 1]} : vector<16x16xf32> to vector<8x16xf32>
    %126 = vector.extract_strided_slice %124 {offsets = [8, 0], sizes = [8, 16], strides = [1, 1]} : vector<16x16xf32> to vector<8x16xf32>
    %c56_37 = arith.constant 56 : index
    %c0_38 = arith.constant 0 : index
    %127 = vector.load %arg3[%c56_37, %c0_38] : memref<136x128xf32, #tpu.memory_space<vmem>>, vector<16x32xf32>
    %cst_39 = arith.constant dense<0.000000e+00> : vector<8x32xf32>
    %128 = tpu.matmul %125, %127, %cst_39 {dimension_numbers = #tpu.dot_dimension_numbers<[1], [0], [0], [1], [0, 0, 1, 1], [], []>} : vector<8x16xf32>, vector<16x32xf32>, vector<8x32xf32> -> vector<8x32xf32>
    %c72_40 = arith.constant 72 : index
    %c64_41 = arith.constant 64 : index
    %129 = vector.load %arg3[%c72_40, %c64_41] : memref<136x128xf32, #tpu.memory_space<vmem>>, vector<32x32xf32>
    %cst_42 = arith.constant dense<0.000000e+00> : vector<8x32xf32>
    %130 = tpu.matmul %35, %129, %cst_42 {dimension_numbers = #tpu.dot_dimension_numbers<[1], [0], [0], [1], [0, 0, 1, 1], [], []>} : vector<8x32xf32>, vector<32x32xf32>, vector<8x32xf32> -> vector<8x32xf32>
    %131 = arith.addf %128, %130 : vector<8x32xf32>
    %c56_43 = arith.constant 56 : index
    %c32_44 = arith.constant 32 : index
    %132 = vector.load %arg3[%c56_43, %c32_44] : memref<136x128xf32, #tpu.memory_space<vmem>>, vector<16x32xf32>
    %cst_45 = arith.constant dense<0.000000e+00> : vector<8x32xf32>
    %133 = tpu.matmul %126, %132, %cst_45 {dimension_numbers = #tpu.dot_dimension_numbers<[1], [0], [0], [1], [0, 0, 1, 1], [], []>} : vector<8x16xf32>, vector<16x32xf32>, vector<8x32xf32> -> vector<8x32xf32>
    %134 = arith.addf %131, %133 : vector<8x32xf32>
    %c24_46 = arith.constant 24 : index
    %c0_47 = arith.constant 0 : index
    %135 = vector.load %arg3[%c24_46, %c0_47] : memref<136x128xf32, #tpu.memory_space<vmem>>, vector<1x32xf32>
    %136 = vector.broadcast %135 : vector<1x32xf32> to vector<8x32xf32>
    %137 = arith.addf %134, %136 : vector<8x32xf32>
    %cst_48 = arith.constant 0.000000e+00 : f32
    %138 = vector.broadcast %cst_48 : f32 to vector<8x32xf32>
    %139 = arith.maximumf %137, %138 : vector<8x32xf32>
    %c72_49 = arith.constant 72 : index
    %c96_50 = arith.constant 96 : index
    %140 = vector.load %arg3[%c72_49, %c96_50] : memref<136x128xf32, #tpu.memory_space<vmem>>, vector<32x32xf32>
    %cst_51 = arith.constant dense<0.000000e+00> : vector<8x32xf32>
    %141 = tpu.matmul %139, %140, %cst_51 {dimension_numbers = #tpu.dot_dimension_numbers<[1], [0], [0], [1], [0, 0, 1, 1], [], []>} : vector<8x32xf32>, vector<32x32xf32>, vector<8x32xf32> -> vector<8x32xf32>
    %c24_52 = arith.constant 24 : index
    %c32_53 = arith.constant 32 : index
    %142 = vector.load %arg3[%c24_52, %c32_53] : memref<136x128xf32, #tpu.memory_space<vmem>>, vector<1x32xf32>
    %143 = vector.broadcast %142 : vector<1x32xf32> to vector<8x32xf32>
    %144 = arith.addf %141, %143 : vector<8x32xf32>
    %cst_54 = arith.constant 0.000000e+00 : f32
    %145 = vector.broadcast %cst_54 : f32 to vector<8x32xf32>
    %146 = arith.maximumf %144, %145 : vector<8x32xf32>
    %c104_55 = arith.constant 104 : index
    %c32_56 = arith.constant 32 : index
    %147 = vector.load %arg3[%c104_55, %c32_56] : memref<136x128xf32, #tpu.memory_space<vmem>>, vector<32x3xf32>
    %cst_57 = arith.constant dense<0.000000e+00> : vector<8x3xf32>
    %148 = tpu.matmul %146, %147, %cst_57 {dimension_numbers = #tpu.dot_dimension_numbers<[1], [0], [0], [1], [0, 0, 1, 1], [], []>} : vector<8x32xf32>, vector<32x3xf32>, vector<8x3xf32> -> vector<8x3xf32>
    %c32_58 = arith.constant 32 : index
    %c56_59 = arith.constant 56 : index
    %149 = vector.load %arg3[%c32_58, %c56_59] : memref<136x128xf32, #tpu.memory_space<vmem>>, vector<1x3xf32>
    %150 = vector.broadcast %149 : vector<1x3xf32> to vector<8x3xf32>
    %151 = arith.addf %148, %150 : vector<8x3xf32>
    %cst_60 = arith.constant dense<0xFF800000> : vector<8xf32>
    %152 = vector.multi_reduction <maximumf>, %151, %cst_60 [1] : vector<8x3xf32> to vector<8xf32>
    %153 = vector.shape_cast %152 : vector<8xf32> to vector<8x1xf32>
    %154 = vector.broadcast %153 : vector<8x1xf32> to vector<8x3xf32>
    %155 = arith.subf %151, %154 : vector<8x3xf32>
    %156 = math.exp %155 : vector<8x3xf32>
    %cst_61 = arith.constant dense<0.000000e+00> : vector<8xf32>
    %157 = vector.multi_reduction <add>, %156, %cst_61 [1] : vector<8x3xf32> to vector<8xf32>
    %158 = vector.shape_cast %157 : vector<8xf32> to vector<8x1xf32>
    %159 = tpu.reciprocal %158 {approx = true} : vector<8x1xf32> -> vector<8x1xf32>
    %160 = arith.mulf %158, %159 : vector<8x1xf32>
    %cst_62 = arith.constant 2.000000e+00 : f32
    %161 = vector.broadcast %cst_62 : f32 to vector<8x1xf32>
    %162 = arith.subf %161, %160 : vector<8x1xf32>
    %163 = arith.mulf %159, %162 : vector<8x1xf32>
    %164 = vector.broadcast %163 : vector<8x1xf32> to vector<8x3xf32>
    %165 = arith.mulf %156, %164 : vector<8x3xf32>
    %166 = arith.cmpf one, %4, %4 : vector<8x3xf32>
    %cst_63 = arith.constant 0.000000e+00 : f32
    %167 = vector.broadcast %cst_63 : f32 to vector<8x3xf32>
    %168 = arith.select %166, %167, %4 : vector<8x3xi1>, vector<8x3xf32>
    %c32_64 = arith.constant 32 : index
    %c40_65 = arith.constant 40 : index
    %169 = vector.load %arg3[%c32_64, %c40_65] : memref<136x128xf32, #tpu.memory_space<vmem>>, vector<3x3xf32>
    %cst_66 = arith.constant dense<0.000000e+00> : vector<8x3xf32>
    %170 = tpu.matmul %165, %169, %cst_66 {dimension_numbers = #tpu.dot_dimension_numbers<[1], [0], [0], [1], [0, 0, 1, 1], [], []>} : vector<8x3xf32>, vector<3x3xf32>, vector<8x3xf32> -> vector<8x3xf32>
    %c32_67 = arith.constant 32 : index
    %c48 = arith.constant 48 : index
    %171 = vector.load %arg3[%c32_67, %c48] : memref<136x128xf32, #tpu.memory_space<vmem>>, vector<3x3xf32>
    %cst_68 = arith.constant dense<0.000000e+00> : vector<8x3xf32>
    %172 = tpu.matmul %168, %171, %cst_68 {dimension_numbers = #tpu.dot_dimension_numbers<[1], [0], [0], [1], [0, 0, 1, 1], [], []>} : vector<8x3xf32>, vector<3x3xf32>, vector<8x3xf32> -> vector<8x3xf32>
    %173 = arith.addf %170, %172 : vector<8x3xf32>
    %c32_69 = arith.constant 32 : index
    %c32_70 = arith.constant 32 : index
    %174 = vector.load %arg3[%c32_69, %c32_70] : memref<136x128xf32, #tpu.memory_space<vmem>>, vector<1x3xf32>
    %175 = vector.broadcast %174 : vector<1x3xf32> to vector<8x3xf32>
    %176 = arith.addf %173, %175 : vector<8x3xf32>
    %cst_71 = arith.constant 0.000000e+00 : f32
    %177 = vector.broadcast %cst_71 : f32 to vector<8x3xf32>
    %178 = arith.maximumf %176, %177 : vector<8x3xf32>
    %c8 = arith.constant 8 : index
    %c0_72 = arith.constant 0 : index
    %179 = vector.load %arg3[%c8, %c0_72] : memref<136x128xf32, #tpu.memory_space<vmem>>, vector<3x128xf32>
    %cst_73 = arith.constant dense<0.000000e+00> : vector<8x128xf32>
    %180 = tpu.matmul %178, %179, %cst_73 {dimension_numbers = #tpu.dot_dimension_numbers<[1], [0], [0], [1], [0, 0, 1, 1], [], []>} : vector<8x3xf32>, vector<3x128xf32>, vector<8x128xf32> -> vector<8x128xf32>
    %c0_74 = arith.constant 0 : index
    %c0_75 = arith.constant 0 : index
    %181 = vector.load %arg3[%c0_74, %c0_75] : memref<136x128xf32, #tpu.memory_space<vmem>>, vector<1x128xf32>
    %182 = vector.broadcast %181 : vector<1x128xf32> to vector<8x128xf32>
    %183 = arith.addf %180, %182 : vector<8x128xf32>
    %184 = tpu.iota {dimensions = array<i32: 1>} : vector<8x128xi32>
    %185 = vector.extract_strided_slice %183 {offsets = [0, 0], sizes = [8, 3], strides = [1, 1]} : vector<8x128xf32> to vector<8x3xf32>
    %cst_76 = arith.constant dense<0xFF800000> : vector<8xf32>
    %186 = vector.multi_reduction <maximumf>, %185, %cst_76 [1] : vector<8x3xf32> to vector<8xf32>
    %187 = vector.shape_cast %186 : vector<8xf32> to vector<8x1xf32>
    %c3_i32 = arith.constant 3 : i32
    %188 = vector.broadcast %c3_i32 : i32 to vector<8x128xi32>
    %189 = arith.cmpi slt, %184, %188 : vector<8x128xi32>
    %190 = vector.broadcast %187 : vector<8x1xf32> to vector<8x128xf32>
    %191 = arith.subf %183, %190 : vector<8x128xf32>
    %192 = math.exp %191 : vector<8x128xf32>
    %cst_77 = arith.constant 0.000000e+00 : f32
    %193 = vector.broadcast %cst_77 : f32 to vector<8x128xf32>
    %194 = arith.select %189, %192, %193 : vector<8x128xi1>, vector<8x128xf32>
    %cst_78 = arith.constant dense<0.000000e+00> : vector<8xf32>
    %195 = vector.multi_reduction <add>, %194, %cst_78 [1] : vector<8x128xf32> to vector<8xf32>
    %196 = vector.shape_cast %195 : vector<8xf32> to vector<8x1xf32>
    %197 = tpu.reciprocal %196 {approx = true} : vector<8x1xf32> -> vector<8x1xf32>
    %198 = arith.mulf %196, %197 : vector<8x1xf32>
    %cst_79 = arith.constant 2.000000e+00 : f32
    %199 = vector.broadcast %cst_79 : f32 to vector<8x1xf32>
    %200 = arith.subf %199, %198 : vector<8x1xf32>
    %201 = arith.mulf %197, %200 : vector<8x1xf32>
    %202 = vector.broadcast %201 : vector<8x1xf32> to vector<8x128xf32>
    %203 = arith.mulf %194, %202 : vector<8x128xf32>
    %c0_80 = arith.constant 0 : index
    %c0_81 = arith.constant 0 : index
    %204 = vector.load %arg4[%c0_80, %c0_81] : memref<8x128xf32, #tpu.memory_space<vmem>>, vector<8x128xf32>
    tpu.vector_store %arg4[%c0_80, %c0_81], %203 {strides = array<i32>} : memref<8x128xf32, #tpu.memory_space<vmem>>, vector<8x128xf32>,
    return
  }
  func.func @transform_0(%arg0: i32) -> (i32, i32) {
    %c0_i32 = arith.constant 0 : i32
    %c0_i32_0 = arith.constant 0 : i32
    return %arg0, %c0_i32 : i32, i32
  }
  func.func @transform_1(%arg0: i32) -> (i32, i32) {
    %c0_i32 = arith.constant 0 : i32
    %c0_i32_0 = arith.constant 0 : i32
    return %arg0, %c0_i32 : i32, i32
  }
  func.func @transform_2(%arg0: i32) -> (i32, i32) {
    %c0_i32 = arith.constant 0 : i32
    %c0_i32_0 = arith.constant 0 : i32
    %c0_i32_1 = arith.constant 0 : i32
    return %c0_i32, %c0_i32_0 : i32, i32
  }
  func.func @transform_3(%arg0: i32) -> (i32, i32) {
    %c0_i32 = arith.constant 0 : i32
    %c0_i32_0 = arith.constant 0 : i32
    return %arg0, %c0_i32 : i32, i32
  }
}

</mosaic_0001>

<bundles_post_ra>
// kernel: tpu_custom_call.1
= control target key start
LH: loop header
LB: loop body
LE: loop exit
PB: predicated region body
PF: predicated region fallthrough
CT: control target
= control target key end

     0   :  { %8 = vsyncpa [#allocation3], 0  ;;  %s2045_s0 = inlined_call_operand.hbm [shape: f32[32,128], index: 0, kind: input, shape index: {}]   ;;  %s2046_s1 = inlined_call_operand.vmem [shape: f32[128,8], index: 1, kind: input, shape index: {}]   ;;  %s2047_s2 = inlined_call_operand.vmem [shape: f32[136,128], index: 2, kind: input, shape index: {}]   ;;  %s2048_s3 = inlined_call_operand.hbm [shape: f32[16,128], index: 3, kind: output, shape index: {}]  }
   0x1   :  { %10 = vsyncpa [#allocation3 + $0x1], 0 }
   0x2   :  { %11 = vsyncpa [#allocation4], 0 }
   0x3   :  { %13 = vsyncpa [#allocation4 + $0x1], 0  ;;  %s1618_s12 = smov 0   ;;  %s1620_s13 = smov 0  }
   0x4   :  { %s1622_s14 = smov 0   ;;  %s1624_s15 = smov 0  }
   0x5 LB: > { %s1639_s16 = sadd.s32 4294967295, %s1585_s15   ;;  %s1260_s17 = sadd.s32 4294967294, %s1585_s15   ;;  %s1585_s15 = sphi %s1624_s15, %s2058_s15   ;;  %s1581_s14 = sphi %s1622_s14, %s2057_s14   ;;  %s1577_s13 = sphi %s1620_s13, %s2056_s13   ;;  %s1573_s12 = sphi %s1618_s12, %s2055_s12  }
   0x6   : > { %s1643_s18 = sadd.s32 1, %s1585_s15   ;;  %s26_s19 = sadd.s32 1, %s1581_s14 }
   0x7   : > { %s23_s20 = ssub.s32 %s1585_s15, %s1643_s18  ;;  %p33_p0 = scmp.ne.s32.totalorder %s1581_s14, %s1577_s13 }
   0x8   : > { %p24_p1 = scmp.eq.s32.totalorder %s23_s20, 0  ;;  %p34_p2 = scmp.eq.s32.totalorder %s1585_s15, 0 }
   0x9   : > { %p39_p3 = scmp.ne.s32.totalorder %s1577_s13, %s1573_s12  ;;  %p40_p4 = scmp.eq.s32.totalorder %s1639_s16, 0 }
   0xa   : > { %s1655_s21 = scalar_select %p24_p1, %s1581_s14, %s26_s19  }
   0xb   : > { %p1657_p5 = por %p34_p2, %p33_p0  ;;  %p1661_p6 = por %p40_p4, %p39_p3 }
   0xc   : > { %p110_p7 = scmp.eq.s32.totalorder %s1639_s16, 1  ;;  %p116_p8 = scmp.eq.s32.totalorder %s1260_s17, 1 }
   0xd   : > { %p1329_p10 = scmp.lt.s32.totalorder %s1585_s15, 2  ;;  %s139_s26 = sand.u32 1, %s1581_s14  }
   0xe   : > { %p1668_p11 = por %p110_p7, %p33_p0  ;;  %p1672_p12 = por %p116_p8, %p39_p3 }
   0xf   : > { %s1316_s27 = sshll.u32 %s1585_s15, 4  ;;  %s1263_s28 = sshll.u32 %s139_s26, 4 }
  0x10   : > { %s148_s4 = scalar_lea.hbm %s2045_s0, %s1316_s27  ;;  %s143_s6 = scalar_lea.vmem [#allocation2], %s1263_s28 }
  0x11   : > { %s149_s5 = sshll.u32 %s148_s4, 4  ;;  %s151_s7 = sshll.u32 %s143_s6, 4  ;;  %s150_s5 = int_to_ptr.hbm [resolvable:$true] %s149_s5  ;;  %s152_s7 = int_to_ptr.vmem [resolvable:$true] %s151_s7 }
  0x12   : > { %p1683_p13 = pnand %p1329_p10, %p1657_p5  ;;  %p1266_p0 = scmp.ge.s32.totalorder %s1585_s15, 1 }
  0x13   : > { %p168_p1 = scmp.lt.s32.totalorder %s1585_s15, 3  ;;  %s140_s9 = scalar_lea.sflag [#allocation3], %s139_s26 }
  0x14   : > { %s1489_s10 = sshra.s32 %s150_s5, 4  ;;  %p1493_p3 = pneg %p1683_p13  ;;  %s1490_s10 = int_to_ptr.hbm [resolvable:$true] %s1489_s10 }
  0x15   : > { %s1491_s11 = scalar_lea.hbm %s1490_s10, 16  ;;  %s1496_s20 = scalar_lea.hbm %s2045_s0, 32 }
  0x16   : > { %p1492_p2 = scmp.ne.s32.totalorder %s1490_s10, %s1491_s11  ;;  %p1497_p5 = scmp.lt.s32.totalorder %s1490_s10, %s2045_s0 }
  0x17   : > { %p1498_p8 = scmp.lt.s32.totalorder %s1496_s20, %s1491_s11 }
  0x18   : > { %p1494_p4 = pnand %p1493_p3, %p1492_p2 }
  0x19   : > { %p1499_p10 = por %p1498_p8, %p1497_p5 }
  0x1a   : > { %p1495_p7 = pneg %p1494_p4 }
  0x1c   : > { %p1500_p9 = pnand %p1499_p10, %p1495_p7 }
  0x1e   : > { %1503 = shalt.err (!%p1500_p9)
}
  0x1f   : > { %s1587_s26 = smov 128   ;;  %s1588_s28 = smov 8  }
  0x20   : > { %1324 = dma.hbm_to_vmem [thread:$0]  (!%p1683_p13), %s150_s5, 256, %s152_s7, %s140_s9, %s1587_s26, %s1587_s26, %s1588_s28  }
  0x21   : > { %p169_p2 = pnand %p1266_p0, %p168_p1 }
  0x22   : > { %s1704_s29 = sand.u32 (!%p169_p2), 1, %s1577_s13  }
  0x23   : > { %172 = sbr.rel (%p169_p2) target bundleno = 4132 (0x1024), region = 32  ;;  %s1267_s30 = sshll.u32 (!%p169_p2), %s1704_s29, 4 }
  0x24   : > { %s175_s4 = scalar_lea.sflag (!%p169_p2), [#allocation3], %s1704_s29  ;;  %s178_s6 = scalar_lea.vmem (!%p169_p2), [#allocation2], %s1267_s30 }
  0x28   : > { %1564 = dma.done.wait (%p1661_p6), %s175_s4, 256  }
  0x29   : > { %1566 = vsyncadd (%p1661_p6), %s175_s4, 4294967040  ;;  %v1715_v0 = vld [vmem:[%s2047_s2 + $0x38] sm:$0xff]  ;;  %v1720_v1 = vld [vmem:[%s2047_s2 + $0x40] sm:$0xff]  ;;  %s1589_s10 = smov 64   ;;  %vm232_vm0 = vcmask 130048   ;;  %s1590_s27 = smov 32  }
  0x2a   : > { %v1724_v2 = vpack.i.bf16 %v1715_v0, %v1720_v1  ;;  %v1731_v3 = vld [vmem:[%s2047_s2 + $0x18] ss:$0 sm:$0xff]  ;;  %v1736_v4 = vld [vmem:[%s2047_s2 + $0x80] sm:$0xff]  ;;  %v1759_v12 = vld [vmem:[%s2047_s2 + $0x70] sm:$0xff]  ;;  %s1591_s5 = smov 112   ;;  %vm271_vm1 = vcmask 261120  }
  0x2b   : > { %v1741_v5 = vld [vmem:[%s2047_s2 + $0x78] sm:$0xff]  ;;  %290 = vmatpush.msra.mxu1 %v1736_v4  ;;  %v1749_v10 = vld [vmem:[%s178_s6] sm:$0xff]  ;;  %268 = vrot.lane.b32.xlu1 %v1731_v3, %s1590_s27  ;;  %v1765_v13 = vld [vmem:[%s2047_s2 + $0x68] sm:$0xff]  ;;  %s1592_s26 = smov 96   ;;  %s1805_s8 = sshll.u32 %s1639_s16, 3  ;;  %vm396_vm2 = vcmask 64512  }
  0x2c   : > { %1375 = vrot.lane.b32.xlu0 %v1724_v2, %s1589_s10  ;;  %v1419_v6 = vpack.i.bf16 %v1741_v5, %v1736_v4  ;;  %v215_v11 = vld [vmem:[%s178_s6 + $0x8] sm:$0xff]  ;;  %v1424_v14 = vpack.i.bf16 %v1765_v13, %v1759_v12  ;;  %v389_v15 = vld [vmem:[%s2047_s2 + $0x20] sm:$0xff]  ;;  %v305_v26 = vld [vmem:[%s2047_s2 + $0x50] sm:$0xff]  ;;  %p209_p6 = scmp.lt.s32.totalorder %s1805_s8, 15  ;;  %s1594_s22 = smov 16   ;;  %vm1036_vm6 = vcmask 23552   ;;  %vm1051_vm7 = vcmp.ne.f32.partialorder %v1749_v10, %v1749_v10 }
  0x2d   : > { %291 = vmatpush.msra.mxu1 %v1741_v5  ;;  %v307_v24 = vld [vmem:[%s2047_s2 + $0x60] sm:$0xff]  ;;  %v306_v25 = vld [vmem:[%s2047_s2 + $0x58] sm:$0xff]  ;;  %v304_v27 = vld [vmem:[%s2047_s2 + $0x48] sm:$0xff]  ;;  %s1595_s28 = smov 80   ;;  %s1597_s4 = smov 88   ;;  %vm1062_vm8 = vcmask 1042432  }
  0x2e   : > { %329 = vmatpush.msra.mxu2 %v307_v24  ;;  %v1788_v29 = vpack.i.bf16 %v304_v27, %v305_v26  ;;  %v470_v30 = vld [vmem:[%s2047_s2 + $0x28] sm:$0xff]  ;;  %v471_v31 = vld [vmem:[%s2047_s2 + $0x30] sm:$0xff]  ;;  %v1798_v32 = vpack.i.bf16 %v306_v25, %v307_v24  ;;  %s210_s16 = scalar_select %p209_p6, %s1805_s8, 15  ;;  %v1837_v59 = vld [vmem:[%s2047_s2 + $0x20] ss:$0 sm:$0xff] }
  0x2f   : > { %292 = vmatpush.msra.mxu1 %v1759_v12  ;;  %v1389_v34 = vpack.i.bf16 %v470_v30, %v471_v31  ;;  %v1810_v35 = vld [vmem:[%s2047_s2 + $0x10] ss:$0 sm:$0xff]  ;;  %s1173_s17 = scalar_lea.hbm %s2048_s3, %s1805_s8  ;;  %s1539_s8 = scalar_lea.hbm %s2048_s3, 16 }
  0x30   : > { %330 = vmatpush.msra.mxu2 %v306_v25  ;;  %1380 = vrot.lane.b32.xlu2 %v1798_v32, %s1592_s26  ;;  %s1270_s23 = sshll.u32 %s210_s16, 3  ;;  %s1268_s16 = sshll.u32 %s1704_s29, 3 }
  0x31   : > { %293 = vmatpush.msra.mxu1 %v1765_v13  ;;  %s1820_s19 = scalar_lea.vmem %s2046_s1, %s1270_s23  ;;  %s1177_s20 = sshll.u32 %s1173_s17, 4  ;;  %s1178_s20 = int_to_ptr.hbm [resolvable:$true] %s1177_s20 }
  0x32   : > { %331 = vmatpush.msra.mxu2 %v305_v26  ;;  %v381_v42 = vld [vmem:[%s1820_s19] sm:$0xff]  ;;  %v382_v43 = vld [vmem:[%s1820_s19 + $0x8] sm:$0xff] }
  0x33   : > { %393 = vrot.lane.b32.xlu1 %v389_v15, %s1591_s5  ;;  %653 = vmatpush.msrb.mxu1 %v471_v31 }
  0x34   : > { %229 = vrot.lane.b32.xlu0 %v1731_v3, %s1589_s10  ;;  %332 = vmatpush.msra.mxu2 %v304_v27 }
  0x35   : > { %654 = vmatpush.msrb.mxu1 %v470_v30 }
  0x38   : > { %311 = vrot.lane.b32.xlu2 %v1810_v35, %s1589_s10 }
  0x3b   : > { %1390 = vrot.lane.b32.xlu1 %v1389_v34, %s1589_s10 }
  0x3c   : > { %1385 = vrot.lane.b32.xlu0 %v1788_v29, %s1592_s26 }
  0x40   : > { %552 = vrot.lane.b32.xlu2 %v1749_v10, %s1591_s5 }
  0x44   : > { %554 = vrot.lane.b32.xlu0 %v215_v11, %s1591_s5 }
  0x8a   : > { %v1381_v44 = vpop.permute.xlu2 %1380 }
  0x8b   : > { %v1382_v45 = vunpack.i.l.bf16 %v1381_v44  ;;  %v1383_v47 = vunpack.i.h.bf16 %v1381_v44 }
  0x8d   : > { %372 = vmatpush.msra.mxu3 %v1382_v45  ;;  %v384_v45 = vld [vmem:[%s1820_s19 + $0x18] sm:$0xff] }
  0x8f   : > { %373 = vmatpush.msra.mxu3 %v1383_v47 }
  0x92   : > { %v312_v51 = vpop.permute.xlu2 %311 }
  0x9a   : > { %v1828_v54 = vpop.permute.xlu2 %552 }
  0x9d   : > { %v269_v23 = vpop.permute.xlu1 %268 }
  0x9e   : > { %v1376_v7 = vpop.permute.xlu0 %1375 }
  0x9f   : > { %v1377_v8 = vunpack.i.l.bf16 %v1376_v7  ;;  %v1378_v9 = vunpack.i.h.bf16 %v1376_v7 }
  0xa1   : > { %253 = vmatpush.msra.mxu0 %v1377_v8 }
  0xa3   : > { %254 = vmatpush.msra.mxu0 %v1378_v9  ;;  %v545_v9 = vlaneseq }
  0xa4   : > { %1271 = vmatmul.msk.f32.vlgmr.msra.gmra.mxu0 %vm232_vm0, %v1749_v10 }
  0xa5   : > { %v394_v28 = vpop.permute.xlu1 %393  ;;  %574 = vmatpush.msrb.mxu0 %v471_v31  ;;  %v1845_v15 = vand.u32 127, %v545_v9 }
  0xa6   : > { %v230_v16 = vpop.permute.xlu0 %229  ;;  %436 = vmatpush.msrb.mxu2 %v394_v28 }
  0xa7   : > { %575 = vmatpush.msrb.mxu0 %v470_v30  ;;  %vm547_vm3 = vcmp.ge.s32.totalorder %v1845_v15, 32  ;;  %vm548_vm4 = vcmp.lt.s32.totalorder %v1845_v15, 48  ;;  %vm1149_vm9 = vcmp.lt.s32.totalorder %v1845_v15, 3 }
  0xa8   : > { %vm549_vm5 = vmand %vm547_vm3, %vm548_vm4 }
  0xa9   : > { %730 = vmatpush.msra.mxu0 %v471_v31 }
  0xab   : > { %731 = vmatpush.msra.mxu0 %v470_v30 }
  0xac   : > { %1272 = vmatmul.msk.f32.gmra.mxu0 %vm232_vm0, %v215_v11 }
  0xad   : > { %v1391_v50 = vpop.permute.xlu1 %1390 }
  0xae   : > { %v1386_v46 = vpop.permute.xlu0 %1385  ;;  %v1392_v52 = vunpack.i.l.bf16 %v1391_v50  ;;  %v1393_v53 = vunpack.i.h.bf16 %v1391_v50 }
  0xaf   : > { %v1387_v48 = vunpack.i.l.bf16 %v1386_v46  ;;  %v1388_v49 = vunpack.i.h.bf16 %v1386_v46 }
  0xb1   : > { %374 = vmatpush.msra.mxu3 %v1387_v48 }
  0xb3   : > { %375 = vmatpush.msra.mxu3 %v1388_v49 }
  0xb4   : > { %1293 = vmatmul.msk.f32.vlgmr.msrb.gmra.mxu0 %vm232_vm0, %v1828_v54 }
  0xb5   : > { %518 = vmatpush.msrb.mxu3 %v1392_v52 }
  0xb6   : > { %v555_v55 = vpop.permute.xlu0 %554 }
  0xb7   : > { %519 = vmatpush.msrb.mxu3 %v1393_v53 }
  0xbc   : > { %1294 = vmatmul.msk.f32.gmra.mxu0 %vm232_vm0, %v555_v55 }
 0x121   : > { %v256_v17 = vpop.f32.mrf.mxu0 }
 0x122   : > { %v257_v18 = vadd.f32 %v256_v17, %v230_v16 }
 0x124   : > { %v262_v19 = vmax.f32 %v257_v18, 0.0 }
 0x126   : > { %1273 = vmatmul.msk.f32.vlgmr.msra.gmra.mxu1 %vm271_vm1, %v262_v19  ;;  %v1593_v19 = vmov 0.5  }
 0x127   : > { %807 = vmatpush.msra.mxu1 %v471_v31 }
 0x129   : > { %v259_v20 = vpop.f32.mrf.mxu0  ;;  %808 = vmatpush.msra.mxu1 %v470_v30  ;;  %v1855_v30 = vsel %vm549_vm5, 0.0, %v1593_v19 }
 0x12a   : > { %v260_v21 = vadd.f32 %v259_v20, %v230_v16  ;;  %v1850_v20 = vsel %vm549_vm5, 1.0, %v1593_v19 }
 0x12c   : > { %v263_v22 = vmax.f32 %v260_v21, 0.0 }
 0x12e   : > { %1274 = vmatmul.msk.f32.gmra.mxu1 %vm271_vm1, %v263_v22 }
 0x131   : > { %v577_v16 = vpop.f32.mrf.mxu0 }
 0x139   : > { %v580_v24 = vpop.f32.mrf.mxu0 }
 0x1a3   : > { %v295_v33 = vpop.f32.mrf.mxu1 }
 0x1a4   : > { %v296_v36 = vadd.f32 %v295_v33, %v269_v23 }
 0x1a6   : > { %v301_v39 = vmax.f32 %v296_v36, 0.0 }
 0x1ab   : > { %v298_v37 = vpop.f32.mrf.mxu1 }
 0x1ac   : > { %v299_v38 = vadd.f32 %v298_v37, %v269_v23 }
 0x1ae   : > { %v302_v40 = vmax.f32 %v299_v38, 0.0 }
 0x1b0   : > { %v303_v41 = vsub.f32 %v301_v39, %v302_v40 }
 0x1b2   : > { %1275 = vmatmul.msk.f32.vlgmr.msra.gmra.mxu2 %vm271_vm1, %v303_v41 }
 0x1ba   : > { %1277 = vmatmul.msk.f32.vlgmr.msrb.gmra.mxu2 %vm396_vm2, %v381_v42  ;;  %v383_v42 = vld [vmem:[%s1820_s19 + $0x10] sm:$0xff] }
 0x1c2   : > { %1278 = vmatmul.msk.f32.gmra.mxu2 %vm396_vm2, %v382_v43 }
 0x1ca   : > { %1279 = vmatmul.msk.f32.gmra.mxu2 %vm396_vm2, %v383_v42  ;;  %v386_v42 = vld [vmem:[%s1820_s19 + $0x28] sm:$0xff] }
 0x1d2   : > { %1280 = vmatmul.msk.f32.gmra.mxu2 %vm396_vm2, %v384_v45 }
 0x235   : > { %v334_v56 = vpop.f32.mrf.mxu2 }
 0x236   : > { %v335_v57 = vadd.f32 %v334_v56, %v312_v51 }
 0x238   : > { %v337_v58 = vmax.f32 %v335_v57, 0.0 }
 0x23a   : > { %1276 = vmatmul.msk.f32.vlgmr.msra.gmra.mxu3 %vm271_vm1, %v337_v58 }
 0x23d   : > { %v438_v60 = vpop.f32.mrf.mxu2 }
 0x23e   : > { %v439_v61 = vadd.f32 %v1837_v59, %v438_v60 }
 0x240   : > { %1433 = vtanh.f32 %v439_v61 }
 0x245   : > { %v441_v62 = vpop.f32.mrf.mxu2 }
 0x246   : > { %v1434_v63 = vpop.eup %1433  ;;  %v442_v7 = vadd.f32 %v1837_v59, %v441_v62 }
 0x247   : > { %1285 = vmatmul.msk.f32.vlgmr.msrb.gmra.mxu3 %vm232_vm0, %v1434_v63 }
 0x248   : > { %1435 = vtanh.f32 %v442_v7 }
 0x24d   : > { %v444_v57 = vpop.f32.mrf.mxu2 }
 0x24e   : > { %v1436_v8 = vpop.eup %1435  ;;  %v445_v58 = vadd.f32 %v1837_v59, %v444_v57 }
 0x24f   : > { %1286 = vmatmul.msk.f32.gmra.mxu3 %vm232_vm0, %v1436_v8 }
 0x255   : > { %v447_v60 = vpop.f32.mrf.mxu2 }
 0x256   : > { %v448_v61 = vadd.f32 %v1837_v59, %v447_v60 }
 0x2bd   : > { %v1843_v11 = vpop.f32.mrf.mxu3 }
 0x2ca   : > { %v521_v17 = vpop.f32.mrf.mxu3 }
 0x2cb   : > { %v522_v18 = vadd.f32 %v1810_v35, %v521_v17 }
 0x2cd   : > { %v583_v21 = vadd.f32 %v577_v16, %v522_v18 }
 0x2cf   : > { %v585_v22 = vmul.f32 %v583_v21, %v1850_v20 }
 0x2d1   : > { %1437 = vtanh.f32 %v585_v22 }
 0x2d2   : > { %v524_v23 = vpop.f32.mrf.mxu3 }
 0x2d3   : > { %v525_v25 = vadd.f32 %v1810_v35, %v524_v23 }
 0x2d5   : > { %v584_v26 = vadd.f32 %v580_v24, %v525_v25 }
 0x2d7   : > { %v1438_v27 = vpop.eup %1437  ;;  %v586_v28 = vmul.f32 %v584_v26, %v1850_v20 }
 0x2d8   : > { %v589_v31 = vmul.f32 %v1438_v27, %v1850_v20 }
 0x2d9   : > { %1439 = vtanh.f32 %v586_v28 }
 0x2da   : > { %v591_v33 = vadd.f32 %v589_v31, %v1855_v30 }
 0x2dc   : > { %599 = vrot.lane.b32.xlu1 %v591_v33, %s1592_s26  ;;  %v595_v48 = vmul.f32 %v591_v33, %v1828_v54 }
 0x2df   : > { %v1440_v34 = vpop.eup %1439 }
 0x2e0   : > { %v590_v36 = vmul.f32 %v1440_v34, %v1850_v20 }
 0x2e2   : > { %v592_v37 = vadd.f32 %v590_v36, %v1855_v30 }
 0x2e4   : > { %601 = vrot.lane.b32.xlu2 %v592_v37, %s1592_s26  ;;  %v596_v43 = vmul.f32 %v592_v37, %v555_v55 }
 0x33e   : > { %v602_v38 = vpop.permute.xlu2 %601 }
 0x33f   : > { %v606_v39 = vmul.f32 %v602_v38, %v592_v37 }
 0x341   : > { %611 = vrot.lane.b32.xlu1 %v606_v39, %s1594_s22 }
 0x34e   : > { %v600_v40 = vpop.permute.xlu1 %599 }
 0x34f   : > { %v605_v41 = vmul.f32 %v600_v40, %v591_v33 }
 0x351   : > { %609 = vrot.lane.b32.xlu0 %v605_v41, %s1594_s22  ;;  %v385_v41 = vld [vmem:[%s1820_s19 + $0x20] sm:$0xff] }
 0x352   : > { %1281 = vmatmul.msk.f32.gmra.mxu2 %vm396_vm2, %v385_v41 }
 0x35a   : > { %1282 = vmatmul.msk.f32.gmra.mxu2 %vm396_vm2, %v386_v42 }
 0x3b3   : > { %v612_v44 = vpop.permute.xlu1 %611 }
 0x3b4   : > { %v1868_v46 = vadd.f32 %v612_v44, %v596_v43 }
 0x3b6   : > { %1441 = vtanh.f32 %v1868_v46 }
 0x3bc   : > { %v1442_v47 = vpop.eup %1441 }
 0x3bd   : > { %623 = vrot.lane.b32.xlu0 %v1442_v47, %s1590_s27 }
 0x3c3   : > { %v610_v49 = vpop.permute.xlu0 %609 }
 0x3c4   : > { %v615_v50 = vadd.f32 %v610_v49, %v595_v48 }
 0x3c6   : > { %1443 = vtanh.f32 %v615_v50 }
 0x3c7   : > { %1445 = vtanh.f32 %v445_v58 }
 0x3c8   : > { %1447 = vtanh.f32 %v448_v61 }
 0x3cc   : > { %v1444_v51 = vpop.eup %1443 }
 0x3cd   : > { %621 = vrot.lane.b32.xlu2 %v1444_v51, %s1590_s27  ;;  %v1446_v54 = vpop.eup %1445 }
 0x3ce   : > { %1287 = vmatmul.msk.f32.gmra.mxu3 %vm232_vm0, %v1446_v54  ;;  %v1448_v62 = vpop.eup %1447 }
 0x3d6   : > { %1288 = vmatmul.msk.f32.gmra.mxu3 %vm232_vm0, %v1448_v62 }
 0x427   : > { %v622_v52 = vpop.permute.xlu2 %621 }
 0x428   : > { %v627_v53 = vmul.f32 %v622_v52, %v591_v33  ;;  %v450_v52 = vpop.f32.mrf.mxu2 }
 0x42a   : > { %631 = vrot.lane.b32.xlu1 %v627_v53, %s1595_s28  ;;  %v451_v53 = vadd.f32 %v1837_v59, %v450_v52 }
 0x42f   : > { %v624_v55 = vpop.permute.xlu0 %623 }
 0x430   : > { %v628_v56 = vmul.f32 %v624_v55, %v592_v37  ;;  %v453_v55 = vpop.f32.mrf.mxu2 }
 0x432   : > { %633 = vrot.lane.b32.xlu2 %v628_v56, %s1595_s28  ;;  %v454_v56 = vadd.f32 %v1837_v59, %v453_v55 }
 0x451   : > { %v527_v8 = vpop.f32.mrf.mxu3 }
 0x452   : > { %v528_v9 = vadd.f32 %v1810_v35, %v527_v8 }
 0x459   : > { %v530_v18 = vpop.f32.mrf.mxu3 }
 0x45a   : > { %v531_v21 = vadd.f32 %v1810_v35, %v530_v18 }
 0x48c   : > { %v634_v7 = vpop.permute.xlu2 %633 }
 0x49c   : > { %v632_v63 = vpop.permute.xlu1 %631 }
 0x49d   : > { %1295 = vmatmul.msk.f32.vlgmr.msrb.gmra.mxu1 %vm232_vm0, %v632_v63 }
 0x49e   : > { %914 = vmatpush.msrb.mxu1 %v1720_v1 }
 0x4a0   : > { %915 = vmatpush.msrb.mxu1 %v1715_v0 }
 0x4a5   : > { %1296 = vmatmul.msk.f32.gmra.mxu1 %vm232_vm0, %v634_v7 }
 0x51a   : > { %v656_v16 = vpop.f32.mrf.mxu1 }
 0x51b   : > { %v662_v17 = vadd.f32 %v656_v16, %v528_v9 }
 0x51d   : > { %v664_v19 = vmul.f32 %v662_v17, %v1850_v20 }
 0x51f   : > { %1449 = vtanh.f32 %v664_v19 }
 0x522   : > { %v659_v22 = vpop.f32.mrf.mxu1 }
 0x523   : > { %v663_v23 = vadd.f32 %v659_v22, %v531_v21 }
 0x525   : > { %v1450_v24 = vpop.eup %1449  ;;  %v665_v1 = vmul.f32 %v663_v23, %v1850_v20 }
 0x526   : > { %v668_v0 = vmul.f32 %v1450_v24, %v1850_v20 }
 0x527   : > { %1451 = vtanh.f32 %v665_v1 }
 0x528   : > { %v670_v25 = vadd.f32 %v668_v0, %v1855_v30 }
 0x52a   : > { %676 = vrot.lane.b32.xlu0 %v670_v25, %s1592_s26  ;;  %v672_v37 = vmul.f32 %v670_v25, %v615_v50 }
 0x52d   : > { %v1452_v26 = vpop.eup %1451 }
 0x52e   : > { %v669_v27 = vmul.f32 %v1452_v26, %v1850_v20 }
 0x530   : > { %v671_v28 = vadd.f32 %v669_v27, %v1855_v30 }
 0x532   : > { %678 = vrot.lane.b32.xlu1 %v671_v28, %s1592_s26  ;;  %v673_v43 = vmul.f32 %v671_v28, %v1868_v46 }
 0x59c   : > { %v677_v31 = vpop.permute.xlu0 %676 }
 0x59d   : > { %v682_v33 = vmul.f32 %v677_v31, %v670_v25  ;;  %v388_v31 = vld [vmem:[%s1820_s19 + $0x38] sm:$0xff] }
 0x59f   : > { %686 = vrot.lane.b32.xlu2 %v682_v33, %s1594_s22 }
 0x5a4   : > { %v679_v34 = vpop.permute.xlu1 %678 }
 0x5a5   : > { %v683_v36 = vmul.f32 %v679_v34, %v671_v28 }
 0x5a7   : > { %688 = vrot.lane.b32.xlu0 %v683_v36, %s1594_s22 }
 0x5f9   : > { %v687_v38 = vpop.permute.xlu2 %686 }
 0x5fa   : > { %v1897_v39 = vadd.f32 %v687_v38, %v672_v37 }
 0x5fc   : > { %1453 = vtanh.f32 %v1897_v39 }
 0x602   : > { %v1454_v40 = vpop.eup %1453 }
 0x603   : > { %698 = vrot.lane.b32.xlu1 %v1454_v40, %s1590_s27 }
 0x619   : > { %v689_v44 = vpop.permute.xlu0 %688 }
 0x61a   : > { %v693_v45 = vadd.f32 %v689_v44, %v673_v43 }
 0x61c   : > { %1455 = vtanh.f32 %v693_v45 }
 0x61d   : > { %1457 = vtanh.f32 %v451_v53 }
 0x61e   : > { %1459 = vtanh.f32 %v454_v56 }
 0x622   : > { %v1456_v47 = vpop.eup %1455 }
 0x623   : > { %700 = vrot.lane.b32.xlu2 %v1456_v47, %s1590_s27  ;;  %v1458_v46 = vpop.eup %1457 }
 0x624   : > { %1289 = vmatmul.msk.f32.gmra.mxu3 %vm232_vm0, %v1458_v46  ;;  %v1460_v57 = vpop.eup %1459 }
 0x62c   : > { %1290 = vmatmul.msk.f32.gmra.mxu3 %vm232_vm0, %v1460_v57 }
 0x675   : > { %v699_v48 = vpop.permute.xlu1 %698 }
 0x676   : > { %v704_v49 = vmul.f32 %v699_v48, %v670_v25 }
 0x678   : > { %708 = vrot.lane.b32.xlu0 %v704_v49, %s1595_s28 }
 0x67d   : > { %v701_v50 = vpop.permute.xlu2 %700 }
 0x67e   : > { %v705_v51 = vmul.f32 %v701_v50, %v671_v28  ;;  %v387_v28 = vld [vmem:[%s1820_s19 + $0x30] sm:$0xff]  ;;  %s206_s19 = scalar_lea.vmem [#allocation5], %s1268_s16 }
 0x67f   : > { %1283 = vmatmul.msk.f32.gmra.mxu2 %vm396_vm2, %v387_v28  ;;  %s1175_s5 = sshll.u32 %s206_s19, 4  ;;  %s1176_s5 = int_to_ptr.vmem [resolvable:$true] %s1175_s5 }
 0x680   : > { %710 = vrot.lane.b32.xlu1 %v705_v51, %s1595_s28 }
 0x687   : > { %1284 = vmatmul.msk.f32.gmra.mxu2 %vm396_vm2, %v388_v31 }
 0x6a7   : > { %v533_v60 = vpop.f32.mrf.mxu3 }
 0x6a8   : > { %v534_v61 = vadd.f32 %v1810_v35, %v533_v60 }
 0x6af   : > { %v536_v7 = vpop.f32.mrf.mxu3 }
 0x6b0   : > { %v537_v9 = vadd.f32 %v1810_v35, %v536_v7 }
 0x6ea   : > { %v709_v58 = vpop.permute.xlu0 %708 }
 0x6eb   : > { %1297 = vmatmul.msk.f32.vlgmr.msra.gmra.mxu0 %vm232_vm0, %v709_v58 }
 0x6f2   : > { %v711_v54 = vpop.permute.xlu1 %710 }
 0x6f3   : > { %1298 = vmatmul.msk.f32.gmra.mxu0 %vm232_vm0, %v711_v54 }
 0x702   : > { %v456_v43 = vpop.f32.mrf.mxu2 }
 0x703   : > { %v457_v44 = vadd.f32 %v1837_v59, %v456_v43 }
 0x70a   : > { %v459_v50 = vpop.f32.mrf.mxu2 }
 0x70b   : > { %v460_v51 = vadd.f32 %v1837_v59, %v459_v50 }
 0x768   : > { %v733_v62 = vpop.f32.mrf.mxu0 }
 0x769   : > { %v739_v63 = vadd.f32 %v733_v62, %v534_v61 }
 0x76b   : > { %v741_v8 = vmul.f32 %v739_v63, %v1850_v20 }
 0x76d   : > { %1461 = vtanh.f32 %v741_v8 }
 0x770   : > { %v736_v16 = vpop.f32.mrf.mxu0 }
 0x771   : > { %v740_v17 = vadd.f32 %v736_v16, %v537_v9 }
 0x773   : > { %v1462_v18 = vpop.eup %1461  ;;  %v742_v19 = vmul.f32 %v740_v17, %v1850_v20 }
 0x774   : > { %v745_v21 = vmul.f32 %v1462_v18, %v1850_v20 }
 0x775   : > { %1463 = vtanh.f32 %v742_v19 }
 0x776   : > { %v747_v22 = vadd.f32 %v745_v21, %v1855_v30 }
 0x778   : > { %753 = vrot.lane.b32.xlu2 %v747_v22, %s1592_s26  ;;  %v749_v33 = vmul.f32 %v747_v22, %v1897_v39 }
 0x77b   : > { %v1464_v23 = vpop.eup %1463 }
 0x77c   : > { %v746_v24 = vmul.f32 %v1464_v23, %v1850_v20 }
 0x77e   : > { %v748_v1 = vadd.f32 %v746_v24, %v1855_v30 }
 0x780   : > { %755 = vrot.lane.b32.xlu0 %v748_v1, %s1592_s26  ;;  %v750_v37 = vmul.f32 %v748_v1, %v693_v45 }
 0x7d2   : > { %v754_v0 = vpop.permute.xlu2 %753 }
 0x7d3   : > { %v759_v25 = vmul.f32 %v754_v0, %v747_v22 }
 0x7d5   : > { %763 = vrot.lane.b32.xlu1 %v759_v25, %s1594_s22 }
 0x7f2   : > { %v756_v26 = vpop.permute.xlu0 %755 }
 0x7f3   : > { %v760_v27 = vmul.f32 %v756_v26, %v748_v1 }
 0x7f5   : > { %765 = vrot.lane.b32.xlu2 %v760_v27, %s1594_s22 }
 0x847   : > { %v764_v34 = vpop.permute.xlu1 %763 }
 0x848   : > { %v769_v36 = vadd.f32 %v764_v34, %v749_v33 }
 0x84a   : > { %1465 = vtanh.f32 %v769_v36 }
 0x84f   : > { %v766_v38 = vpop.permute.xlu2 %765 }
 0x850   : > { %v1466_v40 = vpop.eup %1465  ;;  %v770_v41 = vadd.f32 %v766_v38, %v750_v37 }
 0x851   : > { %775 = vrot.lane.b32.xlu0 %v1466_v40, %s1590_s27 }
 0x852   : > { %1467 = vtanh.f32 %v770_v41 }
 0x853   : > { %1469 = vtanh.f32 %v457_v44 }
 0x854   : > { %1471 = vtanh.f32 %v460_v51 }
 0x858   : > { %v1468_v42 = vpop.eup %1467 }
 0x859   : > { %777 = vrot.lane.b32.xlu1 %v1468_v42, %s1590_s27  ;;  %v1470_v39 = vpop.eup %1469 }
 0x85a   : > { %1291 = vmatmul.msk.f32.gmra.mxu3 %vm232_vm0, %v1470_v39  ;;  %v1472_v52 = vpop.eup %1471 }
 0x862   : > { %1292 = vmatmul.msk.f32.gmra.mxu3 %vm232_vm0, %v1472_v52 }
 0x8c3   : > { %v776_v47 = vpop.permute.xlu0 %775 }
 0x8c4   : > { %v781_v48 = vmul.f32 %v776_v47, %v747_v22 }
 0x8c6   : > { %785 = vrot.lane.b32.xlu2 %v781_v48, %s1595_s28 }
 0x8cb   : > { %v778_v45 = vpop.permute.xlu1 %777 }
 0x8cc   : > { %v782_v49 = vmul.f32 %v778_v45, %v748_v1 }
 0x8ce   : > { %787 = vrot.lane.b32.xlu0 %v782_v49, %s1595_s28 }
 0x8dd   : > { %v539_v46 = vpop.f32.mrf.mxu3 }
 0x8de   : > { %v540_v56 = vadd.f32 %v1810_v35, %v539_v46 }
 0x8e5   : > { %v542_v63 = vpop.f32.mrf.mxu3 }
 0x8e6   : > { %v543_v7 = vadd.f32 %v1810_v35, %v542_v63 }
 0x920   : > { %v786_v53 = vpop.permute.xlu2 %785 }
 0x921   : > { %1299 = vmatmul.msk.f32.vlgmr.msra.gmra.mxu1 %vm232_vm0, %v786_v53 }
 0x940   : > { %v788_v55 = vpop.permute.xlu0 %787 }
 0x941   : > { %1300 = vmatmul.msk.f32.gmra.mxu1 %vm232_vm0, %v788_v55 }
 0x99e   : > { %v810_v57 = vpop.f32.mrf.mxu1 }
 0x99f   : > { %v816_v58 = vadd.f32 %v810_v57, %v540_v56 }
 0x9a1   : > { %v818_v54 = vmul.f32 %v816_v58, %v1850_v20 }
 0x9a3   : > { %1473 = vtanh.f32 %v818_v54 }
 0x9a9   : > { %v1474_v60 = vpop.eup %1473 }
 0x9aa   : > { %v822_v61 = vmul.f32 %v1474_v60, %v1850_v20 }
 0x9ac   : > { %v824_v62 = vadd.f32 %v822_v61, %v1855_v30 }
 0x9ae   : > { %830 = vrot.lane.b32.xlu1 %v824_v62, %s1592_s26  ;;  %v826_v1 = vmul.f32 %v824_v62, %v769_v36 }
 0x9be   : > { %v813_v8 = vpop.f32.mrf.mxu1 }
 0x9bf   : > { %v817_v9 = vadd.f32 %v813_v8, %v543_v7 }
 0x9c1   : > { %v819_v16 = vmul.f32 %v817_v9, %v1850_v20 }
 0x9c3   : > { %1475 = vtanh.f32 %v819_v16 }
 0x9c9   : > { %v1476_v17 = vpop.eup %1475 }
 0x9ca   : > { %v823_v18 = vmul.f32 %v1476_v17, %v1850_v20  ;;  %v1052_v17 = vsel %vm1051_vm7, 0.0, %v1749_v10  ;;  %v1117_v10 = vld [vmem:[%s2047_s2 + $0x8] sm:$0x7] }
 0x9cc   : > { %v825_v19 = vadd.f32 %v823_v18, %v1855_v30 }
 0x9ce   : > { %832 = vrot.lane.b32.xlu2 %v825_v19, %s1592_s26  ;;  %v827_v20 = vmul.f32 %v825_v19, %v770_v41 }
 0xa20   : > { %v831_v21 = vpop.permute.xlu1 %830 }
 0xa21   : > { %v836_v22 = vmul.f32 %v831_v21, %v824_v62 }
 0xa23   : > { %840 = vrot.lane.b32.xlu0 %v836_v22, %s1594_s22 }
 0xa28   : > { %v833_v23 = vpop.permute.xlu2 %832 }
 0xa29   : > { %v837_v24 = vmul.f32 %v833_v23, %v825_v19 }
 0xa2b   : > { %842 = vrot.lane.b32.xlu1 %v837_v24, %s1594_s22  ;;  %s1163_s22 = scalar_lea.sflag [#allocation4], %s1704_s29 }
 0xa33   : > { %1395 = vrot.lane.b32.xlu1 %v1798_v32, %s1589_s10 }
 0xa3b   : > { %1405 = vrot.lane.b32.xlu1 %v1724_v2, %s1592_s26 }
 0xa43   : > { %1410 = vrot.lane.b32.xlu1 %v1798_v32, %s1590_s27 }
 0xa4b   : > { %966 = vrot.lane.b32.xlu1 %v1731_v3, %s1592_s26 }
 0xa95   : > { %v841_v0 = vpop.permute.xlu0 %840 }
 0xa96   : > { %v846_v25 = vadd.f32 %v841_v0, %v826_v1 }
 0xa98   : > { %1477 = vtanh.f32 %v846_v25 }
 0xa9d   : > { %v843_v26 = vpop.permute.xlu1 %842 }
 0xa9e   : > { %v1478_v30 = vpop.eup %1477  ;;  %v847_v27 = vadd.f32 %v843_v26, %v827_v20 }
 0xa9f   : > { %852 = vrot.lane.b32.xlu2 %v1478_v30, %s1590_s27 }
 0xaa0   : > { %1479 = vtanh.f32 %v847_v27 }
 0xaa5   : > { %v1396_v34 = vpop.permute.xlu1 %1395 }
 0xaa6   : > { %v1480_v28 = vpop.eup %1479  ;;  %v1398_v36 = vunpack.i.h.bf16 %v1396_v34  ;;  %v1397_v37 = vunpack.i.l.bf16 %v1396_v34 }
 0xaa7   : > { %354 = vrot.lane.b32.xlu2 %v1810_v35, %s1590_s27  ;;  %854 = vrot.lane.b32.xlu0 %v1480_v28, %s1590_s27 }
 0xaa8   : > { %887 = vmatpush.msrb.mxu0 %v1397_v37 }
 0xaaa   : > { %888 = vmatpush.msrb.mxu0 %v1398_v36 }
 0xaad   : > { %v1406_v48 = vpop.permute.xlu1 %1405 }
 0xaae   : > { %v1408_v39 = vunpack.i.h.bf16 %v1406_v48  ;;  %v1407_v45 = vunpack.i.l.bf16 %v1406_v48 }
 0xaaf   : > { %1400 = vrot.lane.b32.xlu0 %v1788_v29, %s1589_s10  ;;  %s1596_s10 = smov 72  }
 0xab5   : > { %v1411_v5 = vpop.permute.xlu1 %1410 }
 0xab6   : > { %v1412_v49 = vunpack.i.l.bf16 %v1411_v5 }
 0xab8   : > { %984 = vmatpush.msra.mxu1 %v1412_v49 }
 0xabd   : > { %v967_v60 = vpop.permute.xlu1 %966 }
 0xaf9   : > { %v853_v31 = vpop.permute.xlu2 %852 }
 0xafa   : > { %v858_v33 = vmul.f32 %v853_v31, %v824_v62 }
 0xafc   : > { %896 = vrot.lane.b32.xlu2 %v858_v33, %s1595_s28 }
 0xb01   : > { %v355_v35 = vpop.permute.xlu2 %354 }
 0xb02   : > { %v378_v41 = vadd.f32 %v1843_v11, %v355_v35  ;;  %v1413_v11 = vunpack.i.h.bf16 %v1411_v5 }
 0xb04   : > { %v380_v2 = vmax.f32 %v378_v41, 0.0  ;;  %1415 = vrot.lane.b32.xlu2 %v1788_v29, %s1590_s27  ;;  %985 = vmatpush.msra.mxu1 %v1413_v11 }
 0xb0c   : > { %1425 = vrot.lane.b32.xlu2 %v1424_v14, %s1592_s26 }
 0xb19   : > { %v855_v38 = vpop.permute.xlu0 %854 }
 0xb1a   : > { %v859_v40 = vmul.f32 %v855_v38, %v825_v19  ;;  %v1432_v38 = vld [vmem:[%s2047_s2] ss:$0 sm:$0xff] }
 0xb1c   : > { %921 = vrot.lane.b32.xlu0 %v859_v40, %s1595_s28 }
 0xb21   : > { %v1401_v42 = vpop.permute.xlu0 %1400 }
 0xb22   : > { %v1403_v43 = vunpack.i.h.bf16 %v1401_v42  ;;  %v1402_v44 = vunpack.i.l.bf16 %v1401_v42 }
 0xb24   : > { %889 = vmatpush.msrb.mxu0 %v1402_v44  ;;  %1420 = vrot.lane.b32.xlu0 %v1419_v6, %s1592_s26 }
 0xb26   : > { %890 = vmatpush.msrb.mxu0 %v1403_v43 }
 0xb27   : > { %1301 = vmatmul.msk.f32.vlgmr.msrb.gmra.mxu0 %vm271_vm1, %v380_v2 }
 0xb28   : > { %945 = vmatpush.msra.mxu0 %v1407_v45 }
 0xb2a   : > { %946 = vmatpush.msra.mxu0 %v1408_v39 }
 0xb2c   : > { %1010 = vrot.lane.b32.xlu0 %v1837_v59, %s1596_s10 }
 0xb56   : > { %v897_v47 = vpop.permute.xlu2 %896 }
 0xb57   : > { %1302 = vmatmul.msk.f32.vlgmr.msrb.gmra.mxu1 %vm232_vm0, %v897_v47 }
 0xb5e   : > { %v1416_v6 = vpop.permute.xlu2 %1415 }
 0xb5f   : > { %v1417_v32 = vunpack.i.l.bf16 %v1416_v6  ;;  %v1418_v50 = vunpack.i.h.bf16 %v1416_v6 }
 0xb61   : > { %986 = vmatpush.msra.mxu1 %v1417_v32 }
 0xb63   : > { %987 = vmatpush.msra.mxu1 %v1418_v50 }
 0xb66   : > { %v1426_v29 = vpop.permute.xlu2 %1425 }
 0xb67   : > { %v1427_v55 = vunpack.i.l.bf16 %v1426_v29  ;;  %v1428_v12 = vunpack.i.h.bf16 %v1426_v29 }
 0xb8e   : > { %v922_v4 = vpop.permute.xlu0 %921 }
 0xb8f   : > { %1303 = vmatmul.msk.f32.vlgmr.msra.gmra.mxu0 %vm232_vm0, %v922_v4 }
 0xb96   : > { %v1421_v51 = vpop.permute.xlu0 %1420 }
 0xb97   : > { %v1423_v52 = vunpack.i.h.bf16 %v1421_v51  ;;  %v1422_v53 = vunpack.i.l.bf16 %v1421_v51 }
 0xb99   : > { %1028 = vmatpush.msrb.mxu0 %v1422_v53 }
 0xb9b   : > { %1029 = vmatpush.msrb.mxu0 %v1423_v52 }
 0xb9d   : > { %1030 = vmatpush.msrb.mxu0 %v1427_v55 }
 0xb9e   : > { %v1011_v7 = vpop.permute.xlu0 %1010 }
 0xb9f   : > { %1031 = vmatpush.msrb.mxu0 %v1428_v12 }
 0xba4   : > { %v892_v13 = vpop.f32.mrf.mxu0 }
 0xbd4   : > { %v917_v14 = vpop.f32.mrf.mxu1 }
 0xbd5   : > { %v918_v46 = vadd.f32 %v917_v14, %v892_v13 }
 0xc0c   : > { %v948_v56 = vpop.f32.mrf.mxu0 }
 0xc0d   : > { %v951_v57 = vadd.f32 %v948_v56, %v918_v46 }
 0xc0f   : > { %v952_v58 = vadd.f32 %v1731_v3, %v951_v57  ;;  %v1053_v3 = vld [vmem:[%s2047_s2 + $0x20] sm:$0x7] }
 0xc10   : > { %1058 = vrot.lane.b32.xlu0 %v1053_v3, %s1595_s28 }
 0xc11   : > { %v953_v54 = vmax.f32 %v952_v58, 0.0 }
 0xc13   : > { %1304 = vmatmul.msk.f32.vlgmr.msra.gmra.mxu1 %vm271_vm1, %v953_v54 }
 0xc18   : > { %1085 = vrot.lane.b32.xlu0 %v1053_v3, %s1597_s4 }
 0xc20   : > { %1055 = vrot.lane.b32.xlu0 %v1052_v17, %s1595_s28  ;;  %s1533_s28 = sshra.s32 %s1178_s20, 4  ;;  %s1534_s28 = int_to_ptr.hbm [resolvable:$true] %s1533_s28 }
 0xc21   : > { %s1535_s10 = scalar_lea.hbm %s1534_s28, 8  ;;  %p1540_p1 = scmp.lt.s32.totalorder %s1534_s28, %s2048_s3 }
 0xc22   : > { %p1536_p9 = scmp.ne.s32.totalorder %s1534_s28, %s1535_s10  ;;  %p1541_p3 = scmp.lt.s32.totalorder %s1539_s8, %s1535_s10 }
 0xc24   : > { %p1537_p13 = pnand %p1536_p9, %p1668_p11  ;;  %p1542_p4 = por %p1541_p3, %p1540_p1 }
 0xc26   : > { %p1538_p0 = pneg %p1537_p13 }
 0xc28   : > { %1112 = vrot.lane.b32.xlu0 %v1837_v59, %s1592_s26  ;;  %p1543_p7 = pnand %p1542_p4, %p1538_p0 }
 0xc82   : > { %v1059_v24 = vpop.permute.xlu0 %1058 }
 0xc83   : > { %1306 = vmatpush.msk.msrb.mxu1 %vm1062_vm8, %v1059_v24 }
 0xc85   : > { %1310 = vmatpush.msk.msra.mxu1 %vm1062_vm8, %v1117_v10 }
 0xc8a   : > { %v1086_v1 = vpop.permute.xlu0 %1085 }
 0xc8b   : > { %1308 = vmatpush.msk.msra.mxu0 %vm1062_vm8, %v1086_v1 }
 0xc90   : > { %v989_v61 = vpop.f32.mrf.mxu1 }
 0xc91   : > { %v990_v62 = vadd.f32 %v989_v61, %v967_v60 }
 0xc92   : > { %v1056_v0 = vpop.permute.xlu0 %1055 }
 0xc93   : > { %v992_v63 = vmax.f32 %v990_v62, 0.0  ;;  %1307 = vmatmul.msk.f32.vlgmr.msrb.gmra.mxu1 %vm1036_vm6, %v1056_v0 }
 0xc95   : > { %1305 = vmatmul.msk.f32.vlgmr.msrb.gmra.mxu0 %vm271_vm1, %v992_v63 }
 0xc9a   : > { %v1113_v33 = vpop.permute.xlu0 %1112 }
 0xd10   : > { %v1082_v28 = vpop.f32.mrf.mxu1 }
 0xd12   : > { %v1033_v8 = vpop.f32.mrf.mxu0 }
 0xd13   : > { %v1034_v9 = vadd.f32 %v1033_v8, %v1011_v7 }
 0xd15   : > { %v1037_v16 = vsel %vm1036_vm6, %v1034_v9, -inf }
 0xd16   : > { %1038 = vmax.xlane.f32.xlu1 %v1037_v16 }
 0xd89   : > { %v1039_v18 = vpop.xlane.xlu1 %1038 }
 0xd8a   : > { %v1040_v19 = vsub.f32 %v1034_v9, %v1039_v18 }
 0xd8c   : > { %v1041_v21 = vmul.f32 1.442695, %v1040_v19 }
 0xd8e   : > { %1481 = vpow2.f32 %v1041_v21 }
 0xd94   : > { %v1482_v22 = vpop.eup %1481 }
 0xd95   : > { %v1043_v23 = vsel %vm1036_vm6, %v1482_v22, 0.0 }
 0xd96   : > { %1044 = vadd.xlane.f32.xlu2 %v1043_v23 }
 0xe09   : > { %v1045_v59 = vpop.xlane.xlu2 %1044 }
 0xe0a   : > { %1483 = vrcp.f32 %v1045_v59 }
 0xe10   : > { %v1484_v25 = vpop.eup %1483 }
 0xe11   : > { %v1047_v20 = vmul.f32 %v1484_v25, %v1045_v59 }
 0xe13   : > { %v1048_v26 = vsub.f32 2.0, %v1047_v20 }
 0xe15   : > { %v1049_v30 = vmul.f32 %v1484_v25, %v1048_v26 }
 0xe17   : > { %v1050_v27 = vmul.f32 %v1482_v22, %v1049_v30 }
 0xe19   : > { %1309 = vmatmul.msk.f32.vlgmr.msra.gmra.mxu0 %vm1036_vm6, %v1050_v27 }
 0xe96   : > { %v1109_v31 = vpop.f32.mrf.mxu0 }
 0xe97   : > { %v1110_v34 = vadd.f32 %v1109_v31, %v1082_v28 }
 0xe99   : > { %v1115_v36 = vadd.f32 %v1113_v33, %v1110_v34 }
 0xe9b   : > { %v1116_v37 = vmax.f32 %v1115_v36, 0.0 }
 0xe9d   : > { %1311 = vmatmul.msk.f32.vlgmr.msra.gmra.mxu1 %vm1036_vm6, %v1116_v37 }
 0xf1a   : > { %v1143_v40 = vpop.f32.mrf.mxu1 }
 0xf1b   : > { %v1144_v35 = vadd.f32 %v1432_v38, %v1143_v40 }
 0xf1d   : > { %v1146_v41 = vsel %vm1036_vm6, %v1144_v35, -inf }
 0xf1e   : > { %1147 = vmax.xlane.f32.xlu0 %v1146_v41 }
 0xf91   : > { %v1148_v42 = vpop.xlane.xlu0 %1147 }
 0xf92   : > { %v1150_v43 = vsub.f32 %v1144_v35, %v1148_v42 }
 0xf94   : > { %v1151_v44 = vmul.f32 1.442695, %v1150_v43 }
 0xf96   : > { %1485 = vpow2.f32 %v1151_v44 }
 0xf9c   : > { %v1486_v2 = vpop.eup %1485 }
 0xf9d   : > { %v1153_v47 = vsel %vm1149_vm9, %v1486_v2, 0.0 }
 0xf9e   : > { %1154 = vadd.xlane.f32.xlu2 %v1153_v47 }
0x1011   : > { %v1155_v48 = vpop.xlane.xlu2 %1154 }
0x1012   : > { %1487 = vrcp.f32 %v1155_v48 }
0x1018   : > { %v1488_v39 = vpop.eup %1487 }
0x1019   : > { %v1157_v45 = vmul.f32 %v1488_v39, %v1155_v48 }
0x101b   : > { %v1158_v4 = vsub.f32 2.0, %v1157_v45 }
0x101d   : > { %v1159_v5 = vmul.f32 %v1488_v39, %v1158_v4 }
0x101f   : > { %v1160_v15 = vmul.f32 %v1159_v5, %v1153_v47 }
0x1021   : > { %1161 = vst [vmem:[%s206_s19] sm:$0xff] %v1160_v15 }
0x1022   : > { %1546 = shalt.err (!%p1543_p7)
}
0x1023   : > { %1319 = dma.vmem_to_hbm [thread:$0]  (%p1668_p11), %s1176_s5, 128, %s1178_s20, %s1163_s22  }
0x1024 PF: > { %s1189_s29 = sand.u32 1, %s1573_s12   ;;  %p2054_p5 = scmp.ge.s32.totalorder %s1585_s15, 2 }
0x1025   : > { %s1190_s7 = scalar_lea.sflag [#allocation4], %s1189_s29 }
0x1026   : > { %p1326_p8 = pnand %p2054_p5, %p1672_p12 }
0x1028   : > { %p1327_p10 = pneg %p1326_p8 }
0x102a   : > { %1568 = dma.done.wait (%p1327_p10), %s1190_s7, 128  }
0x102b   : > { %1570 = vsyncadd (%p1327_p10), %s1190_s7, 4294967168  ;;  %p16_p2 = scmp.ge.s32.totalorder %s1643_s18, 4   ;;  %s2055_s12 = smov %s1577_s13 }
0x102c   : > { %s2056_s13 = smov %s1581_s14  ;;  %s2057_s14 = smov %s1655_s21 }
0x102d   : > { %s2058_s15 = smov %s1643_s18  ;;  %18 = sbr.rel (!%p16_p2) target bundleno = 5 (0x5), region = 80 }
0x1032   :  { %1196 = vsyncpa [#allocation3], 1 }
0x1033   :  { %1198 = vsyncpa [#allocation3 + $0x1], 1 }
0x1034   :  { %1199 = vsyncpa [#allocation4], 1 }
0x1035   :  { %1201 = vsyncpa [#allocation4 + $0x1], 1 }

</bundles_post_ra>
